<compile_context>
chip_gen: v7x
topology: tpu7x:2x2x1
jax: 0.10.0
libtpu: 0.0.40
codegen_flags: <defaults>
</compile_context>

<pallas_src>
import jax
import jax.numpy as jnp
from jax.experimental import pallas as pl
from jax.experimental.pallas import tpu as pltpu


def cox_resnet_kernel(x_ref, w1_ref, b1_ref, w2_ref, w3_ref, b2_ref,
                      acc_ref, hout_ref, hbf_ref):
    """Grid = (core_split c, hidden-feature tile j). Streams w2'/w3' tiles; emits
    per-core partial f32 accumulators plus the residual activation h."""
    j = pl.program_id(1)

    @pl.when(j == 0)
    def _init():
        # input_layer: h = x @ w1 + b1 (bf16 inputs, f32 accumulation).
        h = jnp.dot(x_ref[...], w1_ref[...],
                    preferred_element_type=jnp.float32) + b1_ref[...]
        hout_ref[0] = h                                  # f32 residual for the epilogue
        hbf_ref[...] = h.astype(hbf_ref.dtype)           # bf16 resident LHS for w2'
        acc_ref[...] = jnp.zeros_like(acc_ref)           # per-core partial accumulator

    # residual_block first Linear + BN (folded) + ReLU, restricted to this tile of
    # hidden features:  r_j = relu(h @ w2'[:, tile] + b2'[tile])
    r = jnp.dot(hbf_ref[...], w2_ref[0],
                preferred_element_type=jnp.float32) + b2_ref[...]
    r = jnp.maximum(r, 0.0)
    # Dropout(p=0.05): identity in eval mode.

    # second Linear of the residual block: partial-K contraction, accumulated in f32.
    acc_ref[0] += jnp.dot(r.astype(jnp.bfloat16), w3_ref[...],
                          preferred_element_type=jnp.float32)


def _vmem_limit_bytes():
    # ~3/4 of physical VMEM: ~48 MiB on v7x (64 MiB), ~96 MiB on v5e/v6e (128 MiB).
    try:
        cap = pltpu.get_tpu_info().vmem_capacity_bytes
    except Exception:
        return 64 << 20
    return min(int(cap) * 3 // 4, 112 << 20)


@jax.jit
def cox_resnet_forward(x, folded_params):
    (w1, b1, w2_blk, b2p, w3p, b3p, wo_row, bo) = folded_params
    batch, input_size = x.shape
    nk, hidden, tn = w2_blk.shape

    # Core split of the hidden-feature tile axis (uses both v7x TCs; harmless loop
    # reorder on single-core chips -- no redundant weight streaming either way).
    num_splits = 2 if nk % 2 == 0 else 1
    jsteps = nk // num_splits

    x_bf = x.astype(jnp.bfloat16)

    grid_spec = pltpu.PrefetchScalarGridSpec(
        num_scalar_prefetch=0,
        grid=(num_splits, jsteps),
        in_specs=[
            pl.BlockSpec((batch, input_size), lambda c, j: (0, 0)),        # x    (resident)
            pl.BlockSpec((input_size, hidden), lambda c, j: (0, 0)),       # w1   (resident)
            pl.BlockSpec((1, hidden), lambda c, j: (0, 0)),                # b1   (resident)
            pl.BlockSpec((1, hidden, tn),                                  # w2' col tile
                         lambda c, j: (c * jsteps + j, 0, 0)),             #  (pre-blocked, contiguous)
            pl.BlockSpec((tn, hidden),                                     # w3' row tile
                         lambda c, j: (c * jsteps + j, 0)),
            pl.BlockSpec((1, tn), lambda c, j: (0, c * jsteps + j)),       # b2' tile
        ],
        out_specs=[
            pl.BlockSpec((1, batch, hidden), lambda c, j: (c, 0, 0)),      # per-core partial acc
            pl.BlockSpec((1, batch, hidden), lambda c, j: (c, 0, 0)),      # per-core h (residual)
        ],
        scratch_shapes=[
            pltpu.VMEM((batch, hidden), jnp.bfloat16),   # bf16 resident LHS of the w2' matmul
        ],
    )

    acc_parts, h_parts = pl.pallas_call(
        cox_resnet_kernel,
        out_shape=(jax.ShapeDtypeStruct((num_splits, batch, hidden), jnp.float32),
                   jax.ShapeDtypeStruct((num_splits, batch, hidden), jnp.float32)),
        grid_spec=grid_spec,
        compiler_params=pltpu.CompilerParams(
            dimension_semantics=("parallel", "arbitrary"),
            vmem_limit_bytes=_vmem_limit_bytes(),
        ),
    )(x_bf, w1, b1, w2_blk, w3p, b2p)

    # Tiny XLA epilogue on (batch, hidden) data: explicit combine of the per-core
    # partials, second (folded) BN + ReLU, residual add, output_layer Linear(H, 1).
    acc = jnp.sum(acc_parts, axis=0)
    h = h_parts[0]
    r2 = jnp.maximum(acc + b3p, 0.0)
    ht = r2 + h
    return jnp.sum(ht * wo_row, axis=-1, keepdims=True) + bo


# ----------------------------- parameter construction -----------------------------

def make_params(key, input_size, hidden_size):
    """Raw PyTorch-style parameters (Linear weights pre-transposed to [in, out])."""
    ks = jax.random.split(key, 12)

    def lin(k, fan_in, fan_out):
        kw, kb = jax.random.split(k)
        bound = 1.0 / jnp.sqrt(fan_in)
        w = jax.random.uniform(kw, (fan_in, fan_out), jnp.float32, -bound, bound)
        b = jax.random.uniform(kb, (1, fan_out), jnp.float32, -bound, bound)
        return w, b

    w1, b1 = lin(ks[0], input_size, hidden_size)        # input_layer
    w2, b2 = lin(ks[1], hidden_size, hidden_size)       # residual_block[0]
    w3, b3 = lin(ks[2], hidden_size, hidden_size)       # residual_block[4]
    wo, bo = lin(ks[3], hidden_size, 1)                 # output_layer

    eps = 1e-5

    def bn_fold(kg, kb, km, kv):
        gamma = 1.0 + 0.1 * jax.random.normal(kg, (1, hidden_size), jnp.float32)
        beta = 0.1 * jax.random.normal(kb, (1, hidden_size), jnp.float32)
        rmean = 0.1 * jax.random.normal(km, (1, hidden_size), jnp.float32)
        rvar = jnp.abs(1.0 + 0.1 * jax.random.normal(kv, (1, hidden_size), jnp.float32))
        scale = gamma / jnp.sqrt(rvar + eps)
        shift = beta - rmean * scale
        return scale, shift

    s1, t1 = bn_fold(ks[4], ks[5], ks[6], ks[7])         # residual_block[1]
    s2, t2 = bn_fold(ks[8], ks[9], ks[10], ks[11])       # residual_block[5]

    return (w1, b1, w2, b2, s1, t1, w3, b3, s2, t2, wo, bo)


def fold_params(params, *, tn=512):
    """Fold eval-mode BN affines into the Linear weights, cast weights to bf16, and
    pre-block w2' column tiles so each per-step DMA is one contiguous chunk."""
    (w1, b1, w2, b2, s1, t1, w3, b3, s2, t2, wo, bo) = params
    hidden = w1.shape[1]
    tn = min(tn, hidden)
    assert tn % 128 == 0, "tile width must be a multiple of 128 lanes"
    assert hidden % tn == 0, "hidden size must be a multiple of the tile width"
    nk = hidden // tn

    bf16 = jnp.bfloat16
    w2p = w2 * s1                       # BN1 scale folded into Linear #2 output features
    b2p = b2 * s1 + t1
    w3p = w3 * s2                       # BN2 scale folded into Linear #3 output features
    b3p = b3 * s2 + t2

    # (hidden_in, hidden_out) -> (nk, hidden_in, tn); block j == w2p[:, j*tn:(j+1)*tn]
    w2_blk = w2p.reshape(hidden, nk, tn).transpose(1, 0, 2)

    return (w1.astype(bf16),
            b1.astype(jnp.float32),
            w2_blk.astype(bf16),
            b2p.astype(jnp.float32),
            w3p.astype(bf16),
            b3p.astype(jnp.float32),
            wo.T.astype(jnp.float32),                 # (1, hidden) output-layer weights
            bo.reshape(1, 1).astype(jnp.float32))


def reference_forward(x, folded_params):
    """Pure-JAX reference with identical arithmetic (bf16 matmul inputs, f32 accum)."""
    (w1, b1, w2_blk, b2p, w3p, b3p, wo_row, bo) = folded_params
    nk, hidden, tn = w2_blk.shape
    w2p = jnp.transpose(w2_blk, (1, 0, 2)).reshape(hidden, hidden)
    bf16 = jnp.bfloat16
    h = jnp.dot(x.astype(bf16), w1, preferred_element_type=jnp.float32) + b1
    r = jnp.maximum(jnp.dot(h.astype(bf16), w2p,
                            preferred_element_type=jnp.float32) + b2p, 0.0)
    r2 = jnp.maximum(jnp.dot(r.astype(bf16), w3p,
                             preferred_element_type=jnp.float32) + b3p, 0.0)
    ht = r2 + h
    return jnp.sum(ht * wo_row, axis=-1, keepdims=True) + bo


if __name__ == "__main__":
    BATCH = 16
    INPUT_SIZE = 128
    HIDDEN_SIZE = 1024   # small stand-in for 4096; tn=256 -> grid (2 core-splits, 2 j-steps)

    key = jax.random.PRNGKey(0)
    k_x, k_p = jax.random.split(key)
    x = jax.random.normal(k_x, (BATCH, INPUT_SIZE), jnp.float32)
    raw = make_params(k_p, INPUT_SIZE, HIDDEN_SIZE)
    folded = fold_params(raw, tn=256)

    out = cox_resnet_forward(x, folded)
    jax.block_until_ready(out)

    ref = reference_forward(x, folded)
    assert out.shape == (BATCH, 1)
    err = float(jnp.max(jnp.abs(out - ref)))
    scale = float(jnp.max(jnp.abs(ref))) + 1.0
    assert err / scale < 2e-3, (err, scale, out, ref)

    print("KERNEL_OK")
</pallas_src>

<mosaic_0001>
module attributes {stable_mosaic.version = 11 : i64} {
  func.func @cox_resnet_kernel(%arg0: i32, %arg1: i32, %arg2: memref<16x128xbf16, #tpu.memory_space<vmem>>, %arg3: memref<128x1024xbf16, #tpu.memory_space<vmem>>, %arg4: memref<1x1024xf32, #tpu.memory_space<vmem>>, %arg5: memref<1x1024x256xbf16, #tpu.memory_space<vmem>>, %arg6: memref<256x1024xbf16, #tpu.memory_space<vmem>>, %arg7: memref<1x256xf32, #tpu.memory_space<vmem>>, %arg8: memref<1x16x1024xf32, #tpu.memory_space<vmem>>, %arg9: memref<1x16x1024xf32, #tpu.memory_space<vmem>>, %arg10: memref<16x1024xbf16, #tpu.memory_space<vmem>>) attributes {dimension_semantics = [#tpu.dimension_semantics<parallel>, #tpu.dimension_semantics<arbitrary>], iteration_bounds = array<i64: 2, 2>, scalar_prefetch = 0 : i64, scratch_operands = 1 : i64, tpu.core_type = #tpu.core_type<tc>, window_params = [{pipeline_mode = #tpu.pipeline_mode<synchronous>, transform_indices = @transform_0, window_bounds = array<i64: 16, 128>}, {pipeline_mode = #tpu.pipeline_mode<synchronous>, transform_indices = @transform_1, window_bounds = array<i64: 128, 1024>}, {pipeline_mode = #tpu.pipeline_mode<synchronous>, transform_indices = @transform_2, window_bounds = array<i64: 1, 1024>}, {transform_indices = @transform_3, window_bounds = array<i64: 1, 1024, 256>}, {transform_indices = @transform_4, window_bounds = array<i64: 256, 1024>}, {transform_indices = @transform_5, window_bounds = array<i64: 1, 256>}, {transform_indices = @transform_6, window_bounds = array<i64: 1, 16, 1024>}, {transform_indices = @transform_7, window_bounds = array<i64: 1, 16, 1024>}]} {
    %c0_i32 = arith.constant 0 : i32
    %0 = arith.cmpi eq, %arg1, %c0_i32 : i32
    %1 = arith.extui %0 : i1 to i32
    %c0_i32_0 = arith.constant 0 : i32
    %2 = arith.cmpi ne, %1, %c0_i32_0 : i32
    scf.if %2 {
      %c0_17 = arith.constant 0 : index
      %c0_18 = arith.constant 0 : index
      %21 = vector.load %arg2[%c0_17, %c0_18] : memref<16x128xbf16, #tpu.memory_space<vmem>>, vector<16x128xbf16>
      %c0_19 = arith.constant 0 : index
      %c0_20 = arith.constant 0 : index
      %22 = vector.load %arg3[%c0_19, %c0_20] : memref<128x1024xbf16, #tpu.memory_space<vmem>>, vector<128x1024xbf16>
      %cst_21 = arith.constant dense<0.000000e+00> : vector<16x1024xf32>
      %23 = tpu.matmul %21, %22, %cst_21 {dimension_numbers = #tpu.dot_dimension_numbers<[1], [0], [0], [1], [0, 0, 1, 1], [], []>} : vector<16x128xbf16>, vector<128x1024xbf16>, vector<16x1024xf32> -> vector<16x1024xf32>
      %c0_22 = arith.constant 0 : index
      %c0_23 = arith.constant 0 : index
      %24 = vector.load %arg4[%c0_22, %c0_23] : memref<1x1024xf32, #tpu.memory_space<vmem>>, vector<1x1024xf32>
      %25 = vector.broadcast %24 : vector<1x1024xf32> to vector<16x1024xf32>
      %26 = arith.addf %23, %25 : vector<16x1024xf32>
      %c0_24 = arith.constant 0 : index
      %c0_25 = arith.constant 0 : index
      %c0_26 = arith.constant 0 : index
      %27 = vector.load %arg9[%c0_24, %c0_25, %c0_26] : memref<1x16x1024xf32, #tpu.memory_space<vmem>>, vector<1x16x1024xf32>
      %28 = vector.shape_cast %27 : vector<1x16x1024xf32> to vector<16x1024xf32>
      %29 = vector.shape_cast %26 : vector<16x1024xf32> to vector<1x16x1024xf32>
      tpu.vector_store %arg9[%c0_24, %c0_25, %c0_26], %29 {strides = array<i32>} : memref<1x16x1024xf32, #tpu.memory_space<vmem>>, vector<1x16x1024xf32>,
      %30 = arith.truncf %26 : vector<16x1024xf32> to vector<16x1024xbf16>
      %c0_27 = arith.constant 0 : index
      %c0_28 = arith.constant 0 : index
      %31 = vector.load %arg10[%c0_27, %c0_28] : memref<16x1024xbf16, #tpu.memory_space<vmem>>, vector<16x1024xbf16>
      tpu.vector_store %arg10[%c0_27, %c0_28], %30 {strides = array<i32>} : memref<16x1024xbf16, #tpu.memory_space<vmem>>, vector<16x1024xbf16>,
      %cst_29 = arith.constant 0.000000e+00 : f32
      %32 = vector.broadcast %cst_29 : f32 to vector<1x16x1024xf32>
      %c0_30 = arith.constant 0 : index
      %c0_31 = arith.constant 0 : index
      %c0_32 = arith.constant 0 : index
      %33 = vector.load %arg8[%c0_30, %c0_31, %c0_32] : memref<1x16x1024xf32, #tpu.memory_space<vmem>>, vector<1x16x1024xf32>
      tpu.vector_store %arg8[%c0_30, %c0_31, %c0_32], %32 {strides = array<i32>} : memref<1x16x1024xf32, #tpu.memory_space<vmem>>, vector<1x16x1024xf32>,
    } else {
    }
    %c0 = arith.constant 0 : index
    %c0_1 = arith.constant 0 : index
    %3 = vector.load %arg10[%c0, %c0_1] : memref<16x1024xbf16, #tpu.memory_space<vmem>>, vector<16x1024xbf16>
    %c0_2 = arith.constant 0 : index
    %c0_3 = arith.constant 0 : index
    %c0_4 = arith.constant 0 : index
    %4 = vector.load %arg5[%c0_2, %c0_3, %c0_4] : memref<1x1024x256xbf16, #tpu.memory_space<vmem>>, vector<1x1024x256xbf16>
    %5 = vector.shape_cast %4 : vector<1x1024x256xbf16> to vector<1024x256xbf16>
    %cst = arith.constant dense<0.000000e+00> : vector<16x256xf32>
    %6 = tpu.matmul %3, %5, %cst {dimension_numbers = #tpu.dot_dimension_numbers<[1], [0], [0], [1], [0, 0, 1, 1], [], []>} : vector<16x1024xbf16>, vector<1024x256xbf16>, vector<16x256xf32> -> vector<16x256xf32>
    %c0_5 = arith.constant 0 : index
    %c0_6 = arith.constant 0 : index
    %7 = vector.load %arg7[%c0_5, %c0_6] : memref<1x256xf32, #tpu.memory_space<vmem>>, vector<1x256xf32>
    %8 = vector.broadcast %7 : vector<1x256xf32> to vector<16x256xf32>
    %9 = arith.addf %6, %8 : vector<16x256xf32>
    %cst_7 = arith.constant 0.000000e+00 : f32
    %10 = vector.broadcast %cst_7 : f32 to vector<16x256xf32>
    %11 = arith.maximumf %9, %10 : vector<16x256xf32>
    %c0_8 = arith.constant 0 : index
    %c0_9 = arith.constant 0 : index
    %c0_10 = arith.constant 0 : index
    %12 = vector.load %arg8[%c0_8, %c0_9, %c0_10] : memref<1x16x1024xf32, #tpu.memory_space<vmem>>, vector<1x16x1024xf32>
    %13 = vector.shape_cast %12 : vector<1x16x1024xf32> to vector<16x1024xf32>
    %14 = arith.truncf %11 : vector<16x256xf32> to vector<16x256xbf16>
    %c0_11 = arith.constant 0 : index
    %c0_12 = arith.constant 0 : index
    %15 = vector.load %arg6[%c0_11, %c0_12] : memref<256x1024xbf16, #tpu.memory_space<vmem>>, vector<256x1024xbf16>
    %cst_13 = arith.constant dense<0.000000e+00> : vector<16x1024xf32>
    %16 = tpu.matmul %14, %15, %cst_13 {dimension_numbers = #tpu.dot_dimension_numbers<[1], [0], [0], [1], [0, 0, 1, 1], [], []>} : vector<16x256xbf16>, vector<256x1024xbf16>, vector<16x1024xf32> -> vector<16x1024xf32>
    %17 = arith.addf %13, %16 : vector<16x1024xf32>
    %c0_14 = arith.constant 0 : index
    %c0_15 = arith.constant 0 : index
    %c0_16 = arith.constant 0 : index
    %18 = vector.load %arg8[%c0_14, %c0_15, %c0_16] : memref<1x16x1024xf32, #tpu.memory_space<vmem>>, vector<1x16x1024xf32>
    %19 = vector.shape_cast %18 : vector<1x16x1024xf32> to vector<16x1024xf32>
    %20 = vector.shape_cast %17 : vector<16x1024xf32> to vector<1x16x1024xf32>
    tpu.vector_store %arg8[%c0_14, %c0_15, %c0_16], %20 {strides = array<i32>} : memref<1x16x1024xf32, #tpu.memory_space<vmem>>, vector<1x16x1024xf32>,
    return
  }
  func.func @transform_0(%arg0: i32, %arg1: i32) -> (i32, i32) {
    %c0_i32 = arith.constant 0 : i32
    %c0_i32_0 = arith.constant 0 : i32
    %c0_i32_1 = arith.constant 0 : i32
    return %c0_i32, %c0_i32_0 : i32, i32
  }
  func.func @transform_1(%arg0: i32, %arg1: i32) -> (i32, i32) {
    %c0_i32 = arith.constant 0 : i32
    %c0_i32_0 = arith.constant 0 : i32
    %c0_i32_1 = arith.constant 0 : i32
    return %c0_i32, %c0_i32_0 : i32, i32
  }
  func.func @transform_2(%arg0: i32, %arg1: i32) -> (i32, i32) {
    %c0_i32 = arith.constant 0 : i32
    %c0_i32_0 = arith.constant 0 : i32
    %c0_i32_1 = arith.constant 0 : i32
    return %c0_i32, %c0_i32_0 : i32, i32
  }
  func.func @transform_3(%arg0: i32, %arg1: i32) -> (i32, i32, i32) {
    %c2_i32 = arith.constant 2 : i32
    %0 = arith.muli %arg0, %c2_i32 : i32
    %1 = arith.addi %0, %arg1 : i32
    %c0_i32 = arith.constant 0 : i32
    %c0_i32_0 = arith.constant 0 : i32
    %c0_i32_1 = arith.constant 0 : i32
    return %1, %c0_i32, %c0_i32_0 : i32, i32, i32
  }
  func.func @transform_4(%arg0: i32, %arg1: i32) -> (i32, i32) {
    %c2_i32 = arith.constant 2 : i32
    %0 = arith.muli %arg0, %c2_i32 : i32
    %1 = arith.addi %0, %arg1 : i32
    %c0_i32 = arith.constant 0 : i32
    %c0_i32_0 = arith.constant 0 : i32
    return %1, %c0_i32 : i32, i32
  }
  func.func @transform_5(%arg0: i32, %arg1: i32) -> (i32, i32) {
    %c2_i32 = arith.constant 2 : i32
    %0 = arith.muli %arg0, %c2_i32 : i32
    %1 = arith.addi %0, %arg1 : i32
    %c0_i32 = arith.constant 0 : i32
    %c0_i32_0 = arith.constant 0 : i32
    return %c0_i32, %1 : i32, i32
  }
  func.func @transform_6(%arg0: i32, %arg1: i32) -> (i32, i32, i32) {
    %c0_i32 = arith.constant 0 : i32
    %c0_i32_0 = arith.constant 0 : i32
    %c0_i32_1 = arith.constant 0 : i32
    return %arg0, %c0_i32, %c0_i32_0 : i32, i32, i32
  }
  func.func @transform_7(%arg0: i32, %arg1: i32) -> (i32, i32, i32) {
    %c0_i32 = arith.constant 0 : i32
    %c0_i32_0 = arith.constant 0 : i32
    %c0_i32_1 = arith.constant 0 : i32
    return %arg0, %c0_i32, %c0_i32_0 : i32, i32, i32
  }
}

</mosaic_0001>

<bundles_post_ra>
// kernel: cox_resnet_forward.1
= control target key start
LH: loop header
LB: loop body
LE: loop exit
PB: predicated region body
PF: predicated region fallthrough
CT: control target
= control target key end

     0   :  { %s5243_s0 = inlined_call_operand.hbm [shape: bf16[16,128], index: 0, kind: input, shape index: {}]   ;;  %s5244_s1 = inlined_call_operand.hbm [shape: bf16[128,1024], index: 1, kind: input, shape index: {}]   ;;  %s5245_s2 = inlined_call_operand.hbm [shape: f32[1,1024], index: 2, kind: input, shape index: {}]   ;;  %s5246_s3 = inlined_call_operand.hbm [shape: bf16[4,1024,256], index: 3, kind: input, shape index: {}]   ;;  %s5247_s4 = inlined_call_operand.hbm [shape: bf16[1024,1024], index: 4, kind: input, shape index: {}]   ;;  %s5248_s5 = inlined_call_operand.hbm [shape: f32[1,1024], index: 5, kind: input, shape index: {}]   ;;  %s5249_s6 = inlined_call_operand.hbm [shape: f32[2,16,1024], index: 6, kind: output, shape index: {0}]   ;;  %s5250_s7 = inlined_call_operand.hbm [shape: f32[2,16,1024], index: 7, kind: output, shape index: {1}]  }
   0x1   :  { %5284 = sst [smem:[#allocation38_spill]] %s5244_s1 }
   0x2   :  { %5285 = sst [smem:[#allocation39_spill]] %s5246_s3 }
   0x3   :  { %5286 = sst [smem:[#allocation40_spill]] %s5248_s5 }
   0x4   :  { %5287 = sst [smem:[#allocation41_spill]] %s5249_s6 }
   0x5   :  { %5288 = sst [smem:[#allocation42_spill]] %s5250_s7 }
   0x6   :  { %13 = vsyncpa [#allocation4], 0 }
   0x7   :  { %14 = vsyncpa [#allocation7], 0 }
   0x8   :  { %15 = vsyncpa [#allocation10], 0 }
   0x9   :  { %17 = vsyncpa [#allocation10 + $0x1], 0 }
   0xa   :  { %18 = vsyncpa [#allocation13], 0 }
   0xb   :  { %20 = vsyncpa [#allocation13 + $0x1], 0 }
   0xc   :  { %21 = vsyncpa [#allocation5], 0 }
   0xd   :  { %23 = vsyncpa [#allocation5 + $0x1], 0 }
   0xe   :  { %24 = vsyncpa [#allocation16], 0 }
   0xf   :  { %26 = vsyncpa [#allocation16 + $0x1], 0  ;;  %s4446_s24 = smov 0   ;;  %s4448_s25 = smov 0  }
  0x10   :  { %s4450_s26 = smov 0   ;;  %s4452_s27 = smov 0  }
  0x11   :  { %s4454_s28 = smov 0   ;;  %s4456_s29 = smov 0  }
  0x12   :  { %s4458_s30 = smov 0   ;;  %s4460_s8 = smov 0  }
  0x13   :  { %s4462_s9 = smov 0   ;;  %s4464_s10 = smov 0  }
  0x14   :  { %s4466_s11 = smov 0  }
  0x15 LB: > { %5289 = sst [smem:[#allocation23_spill]] %s4346_s24  ;;  %s4500_s12 = sadd.s32 4294967295, %s4386_s11   ;;  %s4386_s11 = sphi %s4466_s11, %s32_s11   ;;  %s4382_s10 = sphi %s4464_s10, %s5351_s10   ;;  %s4378_s9 = sphi %s4462_s9, %s5350_s9   ;;  %s4374_s8 = sphi %s4460_s8, %s5349_s8   ;;  %s4370_s30 = sphi %s4458_s30, %s5348_s30   ;;  %s4366_s29 = sphi %s4456_s29, %s5355_s29   ;;  %s4362_s28 = sphi %s4454_s28, %s5354_s28   ;;  %s4358_s27 = sphi %s4452_s27, %s5346_s27   ;;  %s4354_s26 = sphi %s4450_s26, %s5353_s26   ;;  %s4350_s25 = sphi %s4448_s25, %s5352_s25   ;;  %s4346_s24 = sphi %s4446_s24, %s5345_s24  }
  0x16   : > { %5290 = sst [smem:[#allocation24_spill]] %s4350_s25  ;;  %s3309_s13 = sadd.s32 4294967294, %s4386_s11  }
  0x17   : > { %5291 = sst [smem:[#allocation25_spill]] %s4362_s28  ;;  %p125_p0 = scmp.ne.s32.totalorder %s4366_s29, %s4362_s28 }
  0x18   : > { %5292 = sst [smem:[#allocation26_spill]] %s4370_s30  ;;  %p126_p1 = scmp.eq.s32.totalorder %s4386_s11, 0 }
  0x19   : > { %5293 = sst [smem:[#allocation27_spill]] %s4374_s8  ;;  %p131_p2 = scmp.ne.s32.totalorder %s4362_s28, %s4358_s27 }
  0x1a   : > { %5294 = sst [smem:[#allocation28_spill]] %s4378_s9  ;;  %p5254_p3 = scmp.eq.s32.totalorder %s4500_s12, 0 }
  0x1b   : > { %5295 = sst [smem:[#allocation29_spill]] %s4382_s10  ;;  %p4508_p4 = por %p126_p1, %p125_p0 }
  0x1c   : > { %5296 = sst [smem:[#allocation30_spill]] %s4500_s12  ;;  %p4515_p5 = por %p5254_p3, %p131_p2 }
  0x1d   : > { %s5297_s14 = scalar_select %p4508_p4, 1, 0 }
  0x1e   : > { %s5298_s16 = scalar_select %p4515_p5, 1, 0 }
  0x1f   : > { %p214_p6 = scmp.ne.s32.totalorder %s4354_s26, %s4350_s25  ;;  %p215_p7 = scmp.eq.s32.totalorder %s4500_s12, 3 }
  0x20   : > { %5299 = sst [smem:[#allocation31_spill]] %s5298_s16  ;;  %p220_p8 = scmp.ne.s32.totalorder %s4350_s25, %s4346_s24 }
  0x21   : > { %p221_p9 = scmp.eq.s32.totalorder %s3309_s13, 3  ;;  %p3316_p10 = scmp.ge.s32.totalorder %s4386_s11, 1 }
  0x22   : > { %p4525_p11 = por %p215_p7, %p214_p6  ;;  %p254_p12 = scmp.lt.s32.totalorder %s4386_s11, 5 }
  0x23   : > { %p4530_p13 = por %p221_p9, %p220_p8  ;;  %s4388_s20 = smov [#allocation6]  }
  0x24   : > { %s5300_s17 = scalar_select %p4525_p11, 1, 0 }
  0x25   : > { %s5302_s18 = scalar_select %p4530_p13, 1, 0 }
  0x26   : > { %5301 = sst [smem:[#allocation32_spill]] %s5300_s17  ;;  %p4534_p0 = pnand %p3316_p10, %p254_p12 }
  0x27   : > { %5303 = sst [smem:[#allocation33_spill]] %s5302_s18  ;;  %s279_s21 = sshll.u32 %s4388_s20, 4  ;;  %s280_s21 = int_to_ptr.vmem [resolvable:$true] %s279_s21 }
  0x28   : > { %s5304_s19 = scalar_select %p4534_p0, 1, 0 }
  0x29   : > { %p3717_p1 = pneg %p4534_p0  ;;  %s5307_s1 = sld [smem:[#allocation38_spill]] }
  0x2a   : > { %5305 = sst [smem:[#allocation34_spill]] %s5304_s19 }
  0x2b   : > { %p4542_p2 = pnand %p3717_p1, %p5254_p3 }
  0x2d   : > { %s5306_s22 = scalar_select %p4542_p2, 1, 0 }
  0x2e   : > { %p4554_p7 = pneg %p4542_p2 }
  0x2f   : > { %s4046_s13 = scalar_lea.hbm %s5307_s1, 8192 }
  0x30   : > { %p4047_p6 = scmp.ne.s32.totalorder %s5307_s1, %s4046_s13  ;;  %p4053_p10 = scmp.lt.u32.totalorder %s4046_s13, %s5307_s1 }
  0x31   : > { %s5308_s20 = scalar_select %p4554_p7, 1, 0 }
  0x32   : > { %p4049_p8 = pnand %p4554_p7, %p4047_p6 }
  0x34   : > { %p4050_p9 = pneg %p4049_p8 }
  0x36   : > { %p4055_p12 = pnand %p4053_p10, %p4050_p9 }
  0x38   : > { %4058 = shalt.err (!%p4055_p12)
}
  0x39   : > { %s4059_s23 = scalar_lea.vmem %s280_s21, 8192  ;;  %p4067_p11 = scmp.lt.s32.totalorder %s280_s21, %s280_s21 }
  0x3a   : > { %p4060_p1 = scmp.ne.s32.totalorder %s280_s21, %s4059_s23  ;;  %p4068_p5 = scmp.lt.s32.totalorder %s4059_s23, %s4059_s23 }
  0x3c   : > { %p4062_p3 = pnand %p4060_p1, %p4554_p7  ;;  %p4069_p0 = por %p4068_p5, %p4067_p11 }
  0x3e   : > { %p4063_p13 = pneg %p4062_p3 }
  0x40   : > { %p4070_p4 = pnand %p4069_p0, %p4063_p13 }
  0x42   : > { %4073 = shalt.err (!%p4070_p4)
}
  0x43   : > { %s5261_s15 = smov 512   ;;  %s5262_s6 = smov 32  }
  0x44   : > { %3723 = dma.hbm_to_vmem [thread:$0]  (!%p4542_p2), %s5307_s1, 8192, %s280_s21, [#allocation7], %s5261_s15, %s5261_s15, %s5262_s6  }
  0x45   : > { %s41_s27 = sadd.s32 1, %s4378_s9  ;;  %s44_s13 = sadd.s32 1, %s4382_s10 }
  0x46   : > { %p42_p3 = scmp.ge.s32.totalorder %s41_s27, 2  ;;  %s3310_s23 = sshll.u32 %s4382_s10, 1 }
  0x47   : > { %s4577_s7 = sadd.s32 %s4378_s9, %s3310_s23  ;;  %s118_s17 = sadd.s32 1, %s4366_s29 }
  0x48   : > { %s5357_s27 = smov (%p42_p3, %s41_s27), 0  ;;  %s5359_s13 = smov (!%p42_p3, %s44_s13), %s4382_s10 }
  0x49   : > { %5309 = sst [smem:[#allocation35_spill]] %s5357_s27  ;;  %p3747_p4 = scmp.lt.s32.totalorder %s4386_s11, 4 }
  0x4a   : > { %s304_s24 = sand.u32 1, %s4386_s11   ;;  %p46_p5 = scmp.ge.s32.totalorder %s5359_s13, 2 }
  0x4b   : > { %s4586_s21 = sand.u32 1, %s4366_s29   ;;  %s3673_s18 = sshll.u32 %s4577_s7, 14 }
  0x4c   : > { %s5361_s13 = smov (%p46_p5, %s5359_s13), 0  ;;  %s3321_s23 = sshll.u32 %s4586_s21, 10 }
  0x4d   : > { %5310 = sst [smem:[#allocation36_spill]] %s5361_s13  ;;  %s5311_s3 = sld [smem:[#allocation39_spill]] }
  0x4e   : > { %s3311_s9 = sshll.u32 %s5361_s13, 1  ;;  %s201_s8 = ssub.s32 %s4382_s10, %s5361_s13 }
  0x4f   : > { %s114_s30 = sadd.s32 %s3311_s9, %s5357_s27  ;;  %p202_p11 = scmp.eq.s32.totalorder %s201_s8, 0 }
  0x50   : > { %s115_s25 = ssub.s32 %s4577_s7, %s114_s30  ;;  %s308_s16 = scalar_lea.vmem [#allocation9], %s3321_s23 }
  0x51   : > { %p116_p13 = scmp.eq.s32.totalorder %s115_s25, 0  ;;  %s317_s28 = sshll.u32 %s308_s16, 4  ;;  %s4614_s28 = int_to_ptr.vmem [resolvable:$true] %s317_s28 }
  0x52   : > { %s5312_s12 = sadd.s32 1, %s4354_s26  ;;  %p5314_p0 = scmp.ne.s32.totalorder %s5297_s14, 0 }
  0x53   : > { %s4597_s1 = scalar_lea.hbm %s5311_s3, %s3673_s18  ;;  %s4624_s30 = scalar_lea.sflag [#allocation10], %s304_s24 }
  0x54   : > { %s4609_s19 = scalar_select %p202_p11, %s4354_s26, %s5312_s12  }
  0x55   : > { %s4612_s5 = scalar_select %p116_p13, %s4366_s29, %s118_s17  }
  0x56   : > { %p4620_p6 = pnand %p3747_p4, %p5314_p0  ;;  %s4074_s25 = scalar_lea.hbm %s4597_s1, 16384 }
  0x57   : > { %5313 = sst [smem:[#allocation37_spill]] %s4612_s5  ;;  %p4075_p8 = scmp.ne.s32.totalorder %s4597_s1, %s4074_s25 }
  0x58   : > { %s5315_s15 = scalar_select %p4620_p6, 1, 0 }
  0x59   : > { %p4630_p9 = pneg %p4620_p6  ;;  %s4079_s14 = scalar_lea.hbm %s5311_s3, 65536 }
  0x5a   : > { %p4080_p1 = scmp.lt.u32.totalorder %s4597_s1, %s5311_s3  ;;  %p4081_p3 = scmp.lt.u32.totalorder %s4079_s14, %s4074_s25 }
  0x5b   : > { %s5316_s8 = scalar_select %p4630_p9, 1, 0 }
  0x5c   : > { %p4077_p10 = pnand %p4630_p9, %p4075_p8  ;;  %p4082_p4 = por %p4081_p3, %p4080_p1 }
  0x5d   : > { %p4083_p5 = scmp.lt.u32.totalorder %s4074_s25, %s4597_s1 }
  0x5e   : > { %p4078_p12 = pneg %p4077_p10 }
  0x5f   : > { %p4084_p11 = por %p4083_p5, %p4082_p4 }
  0x61   : > { %p4085_p13 = pnand %p4084_p11, %p4078_p12 }
  0x63   : > { %4088 = shalt.err (!%p4085_p13)
}
  0x64   : > { %s4089_s6 = scalar_lea.vmem %s4614_s28, 16384  ;;  %s4391_s24 = smov [#allocation9]  }
  0x65   : > { %p4090_p0 = scmp.ne.s32.totalorder %s4614_s28, %s4089_s6  ;;  %s4094_s9 = sshll.u32 %s4391_s24, 4  ;;  %s4095_s9 = int_to_ptr.vmem [resolvable:$false] %s4094_s9 }
  0x66   : > { %s4096_s12 = scalar_lea.vmem %s4095_s9, 32768  ;;  %p4097_p2 = scmp.lt.s32.totalorder %s4614_s28, %s4095_s9 }
  0x67   : > { %p4092_p8 = pnand %p4090_p0, %p4630_p9  ;;  %p4098_p7 = scmp.lt.s32.totalorder %s4096_s12, %s4089_s6 }
  0x69   : > { %p4093_p10 = pneg %p4092_p8  ;;  %p4099_p1 = por %p4098_p7, %p4097_p2 }
  0x6b   : > { %p4100_p3 = pnand %p4099_p1, %p4093_p10 }
  0x6d   : > { %4103 = shalt.err (!%p4100_p3)
}
  0x6e   : > { %s4392_s25 = smov 128   ;;  %s4393_s14 = smov 8  }
  0x6f   : > { %3730 = dma.hbm_to_vmem [thread:$0]  (!%p4620_p6), %s4597_s1, 16384, %s4614_s28, %s4624_s30, %s4392_s25, %s4392_s25, %s4393_s14  }
  0x70   : > { %s4659_s24 = scalar_lea.hbm %s5247_s4, %s3673_s18  ;;  %s331_s6 = scalar_lea.vmem [#allocation11], %s3321_s23 }
  0x71   : > { %s341_s9 = sshll.u32 %s331_s6, 4  ;;  %s4394_s12 = smov [#allocation3]   ;;  %s4663_s9 = int_to_ptr.vmem [resolvable:$true] %s341_s9 }
  0x72   : > { %s266_s3 = sshll.u32 %s4394_s12, 4  ;;  %s4104_s10 = scalar_lea.hbm %s5243_s0, 128  ;;  %s267_s3 = int_to_ptr.vmem [resolvable:$true] %s266_s3 }
  0x73   : > { %p4105_p2 = scmp.ne.s32.totalorder %s5243_s0, %s4104_s10  ;;  %p5317_p7 = scmp.ne.s32.totalorder %s5308_s20, 0 }
  0x74   : > { %p4111_p5 = scmp.lt.u32.totalorder %s4104_s10, %s5243_s0 }
  0x75   : > { %p4107_p12 = pnand %p4105_p2, %p5317_p7 }
  0x77   : > { %p4108_p4 = pneg %p4107_p12 }
  0x79   : > { %p4113_p11 = pnand %p4111_p5, %p4108_p4 }
  0x7b   : > { %4116 = shalt.err (!%p4113_p11)
}
  0x7c   : > { %s4117_s23 = scalar_lea.vmem %s267_s3, 128  ;;  %p4125_p10 = scmp.lt.s32.totalorder %s267_s3, %s267_s3 }
  0x7d   : > { %p4118_p13 = scmp.ne.s32.totalorder %s267_s3, %s4117_s23  ;;  %p4126_p1 = scmp.lt.s32.totalorder %s4117_s23, %s4117_s23 }
  0x7f   : > { %p4120_p0 = pnand %p4118_p13, %p5317_p7  ;;  %p4127_p3 = por %p4126_p1, %p4125_p10 }
  0x81   : > { %p4121_p8 = pneg %p4120_p0 }
  0x83   : > { %p4128_p6 = pnand %p4127_p3, %p4121_p8 }
  0x85   : > { %4131 = shalt.err (!%p4128_p6)
}
  0x86   : > { %s4395_s5 = smov 64   ;;  %s4396_s27 = smov 4  }
  0x87   : > { %p5318_p2 = scmp.ne.s32.totalorder %s5306_s22, 0  ;;  %s4397_s25 = smov [#allocation8]  }
  0x88   : > { %s293_s14 = sshll.u32 %s4397_s25, 4  ;;  %s3330_s16 = sshll.u32 %s4586_s21, 1  ;;  %s294_s14 = int_to_ptr.vmem [resolvable:$true] %s293_s14 }
  0x89   : > { %3720 = dma.hbm_to_vmem [thread:$0]  (!%p5318_p2), %s5243_s0, 128, %s267_s3, [#allocation4], %s4395_s5, %s4395_s5, %s4396_s27  }
  0x8a   : > { %s4132_s12 = scalar_lea.hbm %s5245_s2, 128 }
  0x8b   : > { %p4133_p6 = scmp.ne.s32.totalorder %s5245_s2, %s4132_s12  ;;  %p4139_p5 = scmp.lt.u32.totalorder %s4132_s12, %s5245_s2 }
  0x8d   : > { %p4135_p12 = pnand %p4133_p6, %p5317_p7 }
  0x8f   : > { %p4136_p4 = pneg %p4135_p12 }
  0x91   : > { %p4141_p11 = pnand %p4139_p5, %p4136_p4 }
  0x93   : > { %4144 = shalt.err (!%p4141_p11)
}
  0x94   : > { %s4145_s3 = scalar_lea.vmem %s294_s14, 128  ;;  %p4153_p10 = scmp.lt.s32.totalorder %s294_s14, %s294_s14 }
  0x95   : > { %p4146_p13 = scmp.ne.s32.totalorder %s294_s14, %s4145_s3  ;;  %p4154_p1 = scmp.lt.s32.totalorder %s4145_s3, %s4145_s3 }
  0x97   : > { %p4148_p0 = pnand %p4146_p13, %p5317_p7  ;;  %p4155_p3 = por %p4154_p1, %p4153_p10 }
  0x99   : > { %p4149_p8 = pneg %p4148_p0 }
  0x9b   : > { %p4156_p9 = pnand %p4155_p3, %p4149_p8 }
  0x9d   : > { %4159 = shalt.err (!%p4156_p9)
}
  0x9e   : > { %3726 = dma.hbm_to_vmem [thread:$0]  (!%p5318_p2), %s5245_s2, 128, %s294_s14, [#allocation7]  }
  0x9f   : > { %s4160_s10 = scalar_lea.hbm %s4659_s24, 16384  ;;  %p5319_p7 = scmp.ne.s32.totalorder %s5316_s8, 0 }
  0xa0   : > { %p4161_p6 = scmp.ne.s32.totalorder %s4659_s24, %s4160_s10  ;;  %s4165_s25 = scalar_lea.hbm %s5247_s4, 65536 }
  0xa1   : > { %p4166_p9 = scmp.lt.u32.totalorder %s4659_s24, %s5247_s4  ;;  %p4167_p5 = scmp.lt.u32.totalorder %s4165_s25, %s4160_s10 }
  0xa2   : > { %p4163_p12 = pnand %p4161_p6, %p5319_p7  ;;  %p4169_p13 = scmp.lt.u32.totalorder %s4160_s10, %s4659_s24 }
  0xa3   : > { %p4168_p11 = por %p4167_p5, %p4166_p9 }
  0xa4   : > { %p4164_p4 = pneg %p4163_p12 }
  0xa5   : > { %p4170_p0 = por %p4169_p13, %p4168_p11 }
  0xa7   : > { %p4171_p8 = pnand %p4170_p0, %p4164_p4 }
  0xa9   : > { %4174 = shalt.err (!%p4171_p8)
}
  0xaa   : > { %s4175_s14 = scalar_lea.vmem %s4663_s9, 16384  ;;  %s4398_s6 = smov [#allocation11]  }
  0xab   : > { %p4176_p2 = scmp.ne.s32.totalorder %s4663_s9, %s4175_s14  ;;  %s4180_s12 = sshll.u32 %s4398_s6, 4  ;;  %s4181_s12 = int_to_ptr.vmem [resolvable:$false] %s4180_s12 }
  0xac   : > { %s4182_s1 = scalar_lea.vmem %s4181_s12, 32768  ;;  %p4183_p3 = scmp.lt.s32.totalorder %s4663_s9, %s4181_s12 }
  0xad   : > { %p4178_p10 = pnand %p4176_p2, %p5319_p7  ;;  %p4184_p6 = scmp.lt.s32.totalorder %s4182_s1, %s4175_s14 }
  0xaf   : > { %p4179_p1 = pneg %p4178_p10  ;;  %p4185_p12 = por %p4184_p6, %p4183_p3 }
  0xb1   : > { %p4186_p9 = pnand %p4185_p12, %p4179_p1 }
  0xb3   : > { %4189 = shalt.err (!%p4186_p9)
}
  0xb4   : > { %p5320_p4 = scmp.ne.s32.totalorder %s5315_s15, 0  ;;  %s5321_s28 = smov 32  }
  0xb5   : > { %s5322_s18 = smov 512   ;;  %s3676_s23 = sshll.u32 %s4577_s7, 5 }
  0xb6   : > { %3733 = dma.hbm_to_vmem [thread:$0]  (!%p5320_p4), %s4659_s24, 16384, %s4663_s9, %s4624_s30, %s5322_s18, %s5322_s18, %s5321_s28  }
  0xb7   : > { %s355_s3 = scalar_lea.vmem [#allocation12], %s3330_s16  ;;  %s5323_s20 = sld [smem:[#allocation40_spill]] }
  0xb8   : > { %s365_s5 = sshll.u32 %s355_s3, 4  ;;  %s352_s25 = scalar_lea.sflag [#allocation13], %s4586_s21  ;;  %s366_s5 = int_to_ptr.vmem [resolvable:$true] %s365_s5 }
  0xbd   : > { %s4733_s13 = scalar_lea.hbm %s5323_s20, %s3676_s23  ;;  %s4195_s24 = scalar_lea.hbm %s5323_s20, 128 }
  0xbe   : > { %s4190_s17 = scalar_lea.hbm %s4733_s13, 32  ;;  %p4196_p0 = scmp.lt.u32.totalorder %s4733_s13, %s5323_s20 }
  0xbf   : > { %p4191_p5 = scmp.ne.s32.totalorder %s4733_s13, %s4190_s17  ;;  %p4197_p8 = scmp.lt.u32.totalorder %s4195_s24, %s4190_s17 }
  0xc0   : > { %p4199_p10 = scmp.lt.u32.totalorder %s4190_s17, %s4733_s13 }
  0xc1   : > { %p4193_p11 = pnand %p4191_p5, %p5319_p7  ;;  %p4198_p2 = por %p4197_p8, %p4196_p0 }
  0xc3   : > { %p4194_p13 = pneg %p4193_p11  ;;  %p4200_p1 = por %p4199_p10, %p4198_p2 }
  0xc5   : > { %p4201_p3 = pnand %p4200_p1, %p4194_p13 }
  0xc7   : > { %4204 = shalt.err (!%p4201_p3)
}
  0xc8   : > { %s4205_s21 = scalar_lea.vmem %s366_s5, 32  ;;  %s4399_s22 = smov [#allocation12]  }
  0xc9   : > { %p4206_p6 = scmp.ne.s32.totalorder %s366_s5, %s4205_s21  ;;  %s4210_s14 = sshll.u32 %s4399_s22, 4  ;;  %s4211_s14 = int_to_ptr.vmem [resolvable:$false] %s4210_s14 }
  0xca   : > { %s4212_s6 = scalar_lea.vmem %s4211_s14, 64  ;;  %p4213_p5 = scmp.lt.s32.totalorder %s366_s5, %s4211_s14 }
  0xcb   : > { %p4208_p12 = pnand %p4206_p6, %p5319_p7  ;;  %p4214_p11 = scmp.lt.s32.totalorder %s4212_s6, %s4205_s21 }
  0xcd   : > { %p4209_p9 = pneg %p4208_p12  ;;  %p4215_p4 = por %p4214_p11, %p4213_p5 }
  0xcf   : > { %p4216_p0 = pnand %p4215_p4, %p4209_p9 }
  0xd1   : > { %4219 = shalt.err (!%p4216_p0)
}
  0xd2   : > { %p5324_p8 = scmp.ne.s32.totalorder %s5315_s15, 0  ;;  %s5325_s12 = sld [smem:[#allocation34_spill]] }
  0xd4   : > { %3736 = dma.hbm_to_vmem [thread:$0]  (!%p5324_p8), %s4733_s13, 32, %s366_s5, %s352_s25  }
  0xd8   : > { %p5326_p13 = scmp.ne.s32.totalorder %s5325_s12, 0 }
  0xd9   : > { %s5327_s1 = sld [smem:[#allocation30_spill]] (!%p5326_p13) }
  0xda   : > { %374 = sbr.rel (%p5326_p13) target bundleno = 1440 (0x5a0), region = 44 }
  0xdf   : > { %p5328_p2 = scmp.eq.s32.totalorder (!%p5326_p13), %s5327_s1, 0 }
  0xe1   : > { %4321 = dma.done.wait (%p5328_p2), [#allocation4], 128   ;;  %p5329_p7 = pmov %p5328_p2 }
  0xe2   : > { %p5330_p10 = pmov %p5328_p2 }
  0xe3   : > { %4323 = vsyncadd (%p5329_p7), [#allocation4], 4294967168 }
  0xe4   : > { %4325 = dma.done.wait (%p5330_p10), [#allocation7], 8320   ;;  %p5331_p1 = pmov %p5328_p2 }
  0xe5   : > { %s5332_s8 = sld [smem:[#allocation25_spill]]  ;;  %s5333_s15 = sld [smem:[#allocation31_spill]] }
  0xe6   : > { %4327 = vsyncadd (%p5331_p1), [#allocation7], 4294958976  ;;  %s388_s28 = sand.u32 1, %s5327_s1  }
  0xe7   : > { %s389_s3 = scalar_lea.sflag [#allocation10], %s388_s28 }
  0xeb   : > { %s390_s18 = sand.u32 1, %s5332_s8   ;;  %p5334_p4 = scmp.ne.s32.totalorder %s5333_s15, 0 }
  0xec   : > { %s3338_s23 = sshll.u32 %s390_s18, 10 }
  0xed   : > { %s4765_s5 = scalar_lea.vmem [#allocation9], %s3338_s23 }
  0xee   : > { %4329 = dma.done.wait (%p5334_p4), %s389_s3, 32768  }
  0xef   : > { %4331 = vsyncadd (%p5334_p4), %s389_s3, 4294934528  ;;  %s3340_s27 = sshll.u32 %s390_s18, 1  ;;  %s4771_s10 = scalar_lea.vmem [#allocation11], %s3338_s23 }
  0xf0   : > { %s407_s13 = scalar_lea.sflag [#allocation13], %s390_s18  ;;  %s4773_s25 = scalar_lea.vmem [#allocation12], %s3340_s27 }
  0xf1   : > { %4333 = dma.done.wait (%p5334_p4), %s407_s13, 32  }
  0xf2   : > { %4335 = vsyncadd (%p5334_p4), %s407_s13, 4294967264  ;;  %s5335_s17 = sld [smem:[#allocation24_spill]] }
  0xf3   : > { %s5336_s16 = sld [smem:[#allocation26_spill]] }
  0xf8   : > { %s4780_s7 = sand.u32 1, %s5335_s17  }
  0xf9   : > { %s3341_s30 = sshll.u32 %s4780_s7, 7  ;;  %p3343_p3 = scmp.ne.s32.totalorder %s5336_s16, 0 }
  0xfa   : > { %s4783_s24 = scalar_lea.vmem [#allocation14], %s3341_s30  ;;  %s4785_s9 = scalar_lea.vmem [#allocation15], %s3341_s30  ;;  %v471_v0 = vld [vmem:[#allocation6] sm:$0xff] (!%p3343_p3)  ;;  %v472_v2 = vld [vmem:[#allocation6 + $0x8] sm:$0xff] (!%p3343_p3)  ;;  %v4400_v8 = vmov (!%p3343_p3), 0   ;;  %v473_v63 = vld [vmem:[#allocation6 + $0x10] sm:$0xff] (!%p3343_p3) }
  0xfb   : > { %468 = sbr.rel (%p3343_p3) target bundleno = 538 (0x21a), region = 72  ;;  %v475_v1 = vld [vmem:[#allocation6 + $0x20] sm:$0xff] (!%p3343_p3)  ;;  %v476_v4 = vld [vmem:[#allocation6 + $0x28] sm:$0xff] (!%p3343_p3)  ;;  %935 = vmatprep.mubr.bf16.mxu0 (!%p3343_p3), %v4400_v8  ;;  %978 = vmatprep.mubr.bf16.mxu1 (!%p3343_p3), %v4400_v8 }
  0xfc   : > { %v3346_v3 = vcombine.high (!%p3343_p3), %v471_v0, %v475_v1  ;;  %v3345_v5 = vcombine.low (!%p3343_p3), %v471_v0, %v475_v1  ;;  %v479_v6 = vld [vmem:[#allocation6 + $0x40] sm:$0xff] (!%p3343_p3)  ;;  %v3348_v9 = vcombine.high (!%p3343_p3), %v472_v2, %v476_v4  ;;  %v3347_v10 = vcombine.low (!%p3343_p3), %v472_v2, %v476_v4  ;;  %v480_v12 = vld [vmem:[#allocation6 + $0x48] sm:$0xff] (!%p3343_p3)  ;;  %v477_v0 = vld [vmem:[#allocation6 + $0x30] sm:$0xff] (!%p3343_p3) }
  0xfd   : > { %v483_v7 = vld [vmem:[#allocation6 + $0x60] sm:$0xff] (!%p3343_p3)  ;;  %v484_v13 = vld [vmem:[#allocation6 + $0x68] sm:$0xff] (!%p3343_p3)  ;;  %v474_v1 = vld [vmem:[#allocation6 + $0x18] sm:$0xff] (!%p3343_p3) }
  0xfe   : > { %v3354_v11 = vcombine.high (!%p3343_p3), %v479_v6, %v483_v7  ;;  %v487_v14 = vld [vmem:[#allocation6 + $0x80] sm:$0xff] (!%p3343_p3)  ;;  %903 = vmatprep.subr.bf16.mxu0 (!%p3343_p3), %v3346_v3  ;;  %v3356_v15 = vcombine.high (!%p3343_p3), %v480_v12, %v484_v13  ;;  %v488_v17 = vld [vmem:[#allocation6 + $0x88] sm:$0xff] (!%p3343_p3)  ;;  %946 = vmatprep.subr.bf16.mxu1 (!%p3343_p3), %v3348_v9  ;;  %v3353_v19 = vcombine.low (!%p3343_p3), %v479_v6, %v483_v7  ;;  %v478_v2 = vld [vmem:[#allocation6 + $0x38] sm:$0xff] (!%p3343_p3) }
  0xff   : > { %v491_v16 = vld [vmem:[#allocation6 + $0xa0] sm:$0xff] (!%p3343_p3)  ;;  %v492_v18 = vld [vmem:[#allocation6 + $0xa8] sm:$0xff] (!%p3343_p3)  ;;  %904 = vmatpush1.bf16.msra.mxu0 (!%p3343_p3), %v3345_v5  ;;  %947 = vmatpush1.bf16.msra.mxu1 (!%p3343_p3), %v3347_v10  ;;  %v3355_v20 = vcombine.low (!%p3343_p3), %v480_v12, %v484_v13  ;;  %v3350_v5 = vcombine.high (!%p3343_p3), %v473_v63, %v477_v0  ;;  %v3352_v6 = vcombine.high (!%p3343_p3), %v474_v1, %v478_v2  ;;  %v481_v7 = vld [vmem:[#allocation6 + $0x50] sm:$0xff] (!%p3343_p3) }
 0x100   : > { %905 = vmatprep.subr.bf16.mxu0 (!%p3343_p3), %v3354_v11  ;;  %v3362_v21 = vcombine.high (!%p3343_p3), %v487_v14, %v491_v16  ;;  %948 = vmatprep.subr.bf16.mxu1 (!%p3343_p3), %v3356_v15  ;;  %v3364_v22 = vcombine.high (!%p3343_p3), %v488_v17, %v492_v18  ;;  %v495_v23 = vld [vmem:[#allocation6 + $0xc0] sm:$0xff] (!%p3343_p3)  ;;  %v496_v25 = vld [vmem:[#allocation6 + $0xc8] sm:$0xff] (!%p3343_p3)  ;;  %v3361_v27 = vcombine.low (!%p3343_p3), %v487_v14, %v491_v16  ;;  %v485_v9 = vld [vmem:[#allocation6 + $0x70] sm:$0xff] (!%p3343_p3) }
 0x101   : > { %v499_v24 = vld [vmem:[#allocation6 + $0xe0] sm:$0xff] (!%p3343_p3)  ;;  %v500_v26 = vld [vmem:[#allocation6 + $0xe8] sm:$0xff] (!%p3343_p3)  ;;  %v3363_v28 = vcombine.low (!%p3343_p3), %v488_v17, %v492_v18  ;;  %v4790_v10 = vld [vmem:[#allocation3] sm:$0xff] (!%p3343_p3)   ;;  %v3349_v13 = vcombine.low (!%p3343_p3), %v473_v63, %v477_v0  ;;  %v3351_v14 = vcombine.low (!%p3343_p3), %v474_v1, %v478_v2  ;;  %v3358_v15 = vcombine.high (!%p3343_p3), %v481_v7, %v485_v9 }
 0x102   : > { %v3370_v29 = vcombine.high %v495_v23, %v499_v24  ;;  %v3372_v30 = vcombine.high %v496_v25, %v500_v26  ;;  %v503_v31 = vld [vmem:[#allocation6 + $0x100] sm:$0xff]  ;;  %v504_v33 = vld [vmem:[#allocation6 + $0x108] sm:$0xff]  ;;  %v3369_v35 = vcombine.low %v495_v23, %v499_v24  ;;  %v3371_v36 = vcombine.low %v496_v25, %v500_v26  ;;  %v482_v11 = vld [vmem:[#allocation6 + $0x58] sm:$0xff] }
 0x103   : > { %906 = vmatpush1.bf16.msra.mxu0 %v3353_v19  ;;  %949 = vmatpush1.bf16.msra.mxu1 %v3355_v20  ;;  %v507_v32 = vld [vmem:[#allocation6 + $0x120] sm:$0xff]  ;;  %v508_v34 = vld [vmem:[#allocation6 + $0x128] sm:$0xff]  ;;  %v486_v12 = vld [vmem:[#allocation6 + $0x78] sm:$0xff]  ;;  %v4401_v2 = vmov 0.0  }
 0x104   : > { %907 = vmatprep.subr.bf16.mxu0 %v3362_v21  ;;  %950 = vmatprep.subr.bf16.mxu1 %v3364_v22  ;;  %v3378_v37 = vcombine.high %v503_v31, %v507_v32  ;;  %v3380_v38 = vcombine.high %v504_v33, %v508_v34  ;;  %v511_v39 = vld [vmem:[#allocation6 + $0x140] sm:$0xff]  ;;  %v512_v41 = vld [vmem:[#allocation6 + $0x148] sm:$0xff]  ;;  %v3377_v43 = vcombine.low %v503_v31, %v507_v32  ;;  %v489_v17 = vld [vmem:[#allocation6 + $0x90] sm:$0xff] }
 0x105   : > { %v515_v40 = vld [vmem:[#allocation6 + $0x160] sm:$0xff]  ;;  %v516_v42 = vld [vmem:[#allocation6 + $0x168] sm:$0xff]  ;;  %v3379_v44 = vcombine.low %v504_v33, %v508_v34  ;;  %v3360_v16 = vcombine.high %v482_v11, %v486_v12  ;;  %v493_v18 = vld [vmem:[#allocation6 + $0xb0] sm:$0xff]  ;;  %v3357_v21 = vcombine.low %v481_v7, %v485_v9  ;;  %v3359_v22 = vcombine.low %v482_v11, %v486_v12  ;;  %1107 = vst [vmem:[%s4783_s24] sm:$0xff] %v4401_v2 }
 0x106   : > { %v3386_v45 = vcombine.high %v511_v39, %v515_v40  ;;  %v3388_v46 = vcombine.high %v512_v41, %v516_v42  ;;  %v519_v47 = vld [vmem:[#allocation6 + $0x180] sm:$0xff]  ;;  %v520_v49 = vld [vmem:[#allocation6 + $0x188] sm:$0xff]  ;;  %v3385_v51 = vcombine.low %v511_v39, %v515_v40  ;;  %v3387_v52 = vcombine.low %v512_v41, %v516_v42  ;;  %v490_v19 = vld [vmem:[#allocation6 + $0x98] sm:$0xff]  ;;  %1108 = vst [vmem:[%s4783_s24 + $0x8] sm:$0xff] %v4401_v2 }
 0x107   : > { %908 = vmatpush1.bf16.msra.mxu0 %v3361_v27  ;;  %951 = vmatpush1.bf16.msra.mxu1 %v3363_v28  ;;  %v523_v48 = vld [vmem:[#allocation6 + $0x1a0] sm:$0xff]  ;;  %v524_v50 = vld [vmem:[#allocation6 + $0x1a8] sm:$0xff]  ;;  %v494_v20 = vld [vmem:[#allocation6 + $0xb8] sm:$0xff]  ;;  %v3366_v23 = vcombine.high %v489_v17, %v493_v18  ;;  %1109 = vst [vmem:[%s4783_s24 + $0x10] sm:$0xff] %v4401_v2 }
 0x108   : > { %909 = vmatprep.subr.bf16.mxu0 %v3370_v29  ;;  %952 = vmatprep.subr.bf16.mxu1 %v3372_v30  ;;  %v3394_v53 = vcombine.high %v519_v47, %v523_v48  ;;  %v3396_v54 = vcombine.high %v520_v49, %v524_v50  ;;  %v527_v55 = vld [vmem:[#allocation6 + $0x1c0] sm:$0xff]  ;;  %v528_v57 = vld [vmem:[#allocation6 + $0x1c8] sm:$0xff]  ;;  %v3393_v59 = vcombine.low %v519_v47, %v523_v48  ;;  %v497_v25 = vld [vmem:[#allocation6 + $0xd0] sm:$0xff] }
 0x109   : > { %v531_v56 = vld [vmem:[#allocation6 + $0x1e0] sm:$0xff]  ;;  %v532_v58 = vld [vmem:[#allocation6 + $0x1e8] sm:$0xff]  ;;  %v3395_v60 = vcombine.low %v520_v49, %v524_v50  ;;  %v3368_v24 = vcombine.high %v490_v19, %v494_v20  ;;  %v501_v26 = vld [vmem:[#allocation6 + $0xf0] sm:$0xff]  ;;  %v3365_v29 = vcombine.low %v489_v17, %v493_v18  ;;  %v3367_v30 = vcombine.low %v490_v19, %v494_v20  ;;  %1110 = vst [vmem:[%s4783_s24 + $0x18] sm:$0xff] %v4401_v2 }
 0x10a   : > { %v3402_v61 = vcombine.high %v527_v55, %v531_v56  ;;  %v3404_v62 = vcombine.high %v528_v57, %v532_v58  ;;  %v3401_v3 = vcombine.low %v527_v55, %v531_v56  ;;  %v3403_v4 = vcombine.low %v528_v57, %v532_v58  ;;  %v498_v27 = vld [vmem:[#allocation6 + $0xd8] sm:$0xff]  ;;  %v505_v33 = vld [vmem:[#allocation6 + $0x110] sm:$0xff]  ;;  %1111 = vst [vmem:[%s4783_s24 + $0x20] sm:$0xff] %v4401_v2 }
 0x10b   : > { %910 = vmatpush1.bf16.msra.mxu0 %v3369_v35  ;;  %953 = vmatpush1.bf16.msra.mxu1 %v3371_v36  ;;  %v502_v28 = vld [vmem:[#allocation6 + $0xf8] sm:$0xff]  ;;  %v3374_v31 = vcombine.high %v497_v25, %v501_v26  ;;  %v509_v34 = vld [vmem:[#allocation6 + $0x130] sm:$0xff]  ;;  %1112 = vst [vmem:[%s4783_s24 + $0x28] sm:$0xff] %v4401_v2  ;;  %1113 = vst [vmem:[%s4783_s24 + $0x30] sm:$0xff] %v4401_v2 }
 0x10c   : > { %911 = vmatprep.subr.bf16.mxu0 %v3378_v37  ;;  %954 = vmatprep.subr.bf16.mxu1 %v3380_v38  ;;  %v3376_v32 = vcombine.high %v498_v27, %v502_v28  ;;  %v506_v35 = vld [vmem:[#allocation6 + $0x118] sm:$0xff]  ;;  %v3373_v37 = vcombine.low %v497_v25, %v501_v26  ;;  %v3375_v38 = vcombine.low %v498_v27, %v502_v28  ;;  %v513_v40 = vld [vmem:[#allocation6 + $0x150] sm:$0xff] }
 0x10d   : > { %v510_v36 = vld [vmem:[#allocation6 + $0x138] sm:$0xff]  ;;  %v3382_v39 = vcombine.high %v505_v33, %v509_v34  ;;  %v517_v41 = vld [vmem:[#allocation6 + $0x170] sm:$0xff]  ;;  %1114 = vst [vmem:[%s4783_s24 + $0x38] sm:$0xff] %v4401_v2  ;;  %1115 = vst [vmem:[%s4783_s24 + $0x40] sm:$0xff] %v4401_v2 }
 0x10e   : > { %v514_v42 = vld [vmem:[#allocation6 + $0x158] sm:$0xff]  ;;  %v521_v48 = vld [vmem:[#allocation6 + $0x190] sm:$0xff]  ;;  %1116 = vst [vmem:[%s4783_s24 + $0x48] sm:$0xff] %v4401_v2  ;;  %1117 = vst [vmem:[%s4783_s24 + $0x50] sm:$0xff] %v4401_v2 }
 0x10f   : > { %912 = vmatpush1.bf16.msra.mxu0 %v3377_v43  ;;  %955 = vmatpush1.bf16.msra.mxu1 %v3379_v44  ;;  %v518_v43 = vld [vmem:[#allocation6 + $0x178] sm:$0xff]  ;;  %v3381_v44 = vcombine.low %v505_v33, %v509_v34  ;;  %v525_v49 = vld [vmem:[#allocation6 + $0x1b0] sm:$0xff]  ;;  %1118 = vst [vmem:[%s4783_s24 + $0x58] sm:$0xff] %v4401_v2  ;;  %1119 = vst [vmem:[%s4783_s24 + $0x60] sm:$0xff] %v4401_v2 }
 0x110   : > { %913 = vmatprep.subr.bf16.mxu0 %v3386_v45  ;;  %956 = vmatprep.subr.bf16.mxu1 %v3388_v46  ;;  %v3383_v45 = vcombine.low %v506_v35, %v510_v36  ;;  %v3390_v46 = vcombine.high %v513_v40, %v517_v41  ;;  %v3392_v47 = vcombine.high %v514_v42, %v518_v43  ;;  %v522_v50 = vld [vmem:[#allocation6 + $0x198] sm:$0xff]  ;;  %v529_v56 = vld [vmem:[#allocation6 + $0x1d0] sm:$0xff] }
 0x111   : > { %v533_v57 = vld [vmem:[#allocation6 + $0x1f0] sm:$0xff]  ;;  %v530_v58 = vld [vmem:[#allocation6 + $0x1d8] sm:$0xff]  ;;  %1120 = vst [vmem:[%s4783_s24 + $0x68] sm:$0xff] %v4401_v2  ;;  %1121 = vst [vmem:[%s4783_s24 + $0x70] sm:$0xff] %v4401_v2 }
 0x112   : > { %v3405_v0 = vcombine.low %v529_v56, %v533_v57  ;;  %1122 = vst [vmem:[%s4783_s24 + $0x78] sm:$0xff] %v4401_v2 }
 0x113   : > { %914 = vmatpush1.bf16.msra.mxu0 %v3385_v51  ;;  %957 = vmatpush1.bf16.msra.mxu1 %v3387_v52  ;;  %v526_v51 = vld [vmem:[#allocation6 + $0x1b8] sm:$0xff]  ;;  %v3389_v52 = vcombine.low %v513_v40, %v517_v41 }
 0x114   : > { %915 = vmatprep.subr.bf16.mxu0 %v3394_v53  ;;  %958 = vmatprep.subr.bf16.mxu1 %v3396_v54  ;;  %v3391_v53 = vcombine.low %v514_v42, %v518_v43  ;;  %v3398_v54 = vcombine.high %v521_v48, %v525_v49  ;;  %v3400_v55 = vcombine.high %v522_v50, %v526_v51 }
 0x117   : > { %916 = vmatpush1.bf16.msra.mxu0 %v3393_v59  ;;  %959 = vmatpush1.bf16.msra.mxu1 %v3395_v60  ;;  %v534_v59 = vld [vmem:[#allocation6 + $0x1f8] sm:$0xff]  ;;  %v3397_v60 = vcombine.low %v521_v48, %v525_v49 }
 0x118   : > { %917 = vmatprep.subr.bf16.mxu0 %v3402_v61  ;;  %960 = vmatprep.subr.bf16.mxu1 %v3404_v62  ;;  %v3399_v61 = vcombine.low %v522_v50, %v526_v51  ;;  %v3406_v62 = vcombine.high %v529_v56, %v533_v57  ;;  %v3408_v63 = vcombine.high %v530_v58, %v534_v59 }
 0x119   : > { %v3407_v1 = vcombine.low %v530_v58, %v534_v59 }
 0x11b   : > { %918 = vmatpush1.bf16.msra.mxu0 %v3401_v3  ;;  %961 = vmatpush1.bf16.msra.mxu1 %v3403_v4  ;;  %v537_v3 = vlaneseq }
 0x11c   : > { %989 = vmatprep.subr.bf16.mxu0 %v3350_v5  ;;  %1032 = vmatprep.subr.bf16.mxu1 %v3352_v6  ;;  %v535_v6 = vld [vmem:[#allocation8] sm:$0xff] }
 0x11d   : > { %v538_v4 = vshrl.u32 %v537_v3, 7 }
 0x11e   : > { %936 = vmatmul.mubr.bf16.vlgmr.msra.gmra.mrb[0].mxu0 %v4790_v10  ;;  %979 = vmatmul.mubr.bf16.vlgmr.msra.gmra.mrb[0].mxu1 %v4790_v10 }
 0x11f   : > { %990 = vmatpush1.bf16.msra.mxu0 %v3349_v13  ;;  %1033 = vmatpush1.bf16.msra.mxu1 %v3351_v14  ;;  %v539_v5 = vsub.s32 0, %v538_v4  ;;  %v547_v7 = vsub.s32 2, %v538_v4  ;;  %v543_v9 = vsub.s32 1, %v538_v4 }
 0x120   : > { %991 = vmatprep.subr.bf16.mxu0 %v3358_v15  ;;  %1034 = vmatprep.subr.bf16.mxu1 %v3360_v16 }
 0x121   : > { %1021 = vmatprep.mubr.bf16.mxu0 %v4400_v8  ;;  %1064 = vmatprep.mubr.bf16.mxu1 %v4400_v8  ;;  %v3384_v8 = vcombine.high %v506_v35, %v510_v36  ;;  %v540_v11 = vrot.slane %v535_v6, %v539_v5  ;;  %v548_v12 = vrot.slane %v535_v6, %v547_v7  ;;  %v555_v35 = vsub.s32 4, %v538_v4 }
 0x122   : > { %v544_v13 = vrot.slane %v535_v6, %v543_v9  ;;  %v563_v36 = vsub.s32 6, %v538_v4 }
 0x123   : > { %992 = vmatpush1.bf16.msra.mxu0 %v3357_v21  ;;  %1035 = vmatpush1.bf16.msra.mxu1 %v3359_v22 }
 0x124   : > { %993 = vmatprep.subr.bf16.mxu0 %v3366_v23  ;;  %1036 = vmatprep.subr.bf16.mxu1 %v3368_v24 }
 0x127   : > { %994 = vmatpush1.bf16.msra.mxu0 %v3365_v29  ;;  %1037 = vmatpush1.bf16.msra.mxu1 %v3367_v30 }
 0x128   : > { %995 = vmatprep.subr.bf16.mxu0 %v3374_v31  ;;  %1038 = vmatprep.subr.bf16.mxu1 %v3376_v32 }
 0x12b   : > { %996 = vmatpush1.bf16.msra.mxu0 %v3373_v37  ;;  %1039 = vmatpush1.bf16.msra.mxu1 %v3375_v38  ;;  %v559_v37 = vsub.s32 5, %v538_v4  ;;  %v567_v38 = vsub.s32 7, %v538_v4 }
 0x12c   : > { %997 = vmatprep.subr.bf16.mxu0 %v3382_v39  ;;  %1040 = vmatprep.subr.bf16.mxu1 %v3384_v8  ;;  %v556_v39 = vrot.slane %v535_v6, %v555_v35  ;;  %v564_v8 = vrot.slane %v535_v6, %v563_v36 }
 0x12d   : > { %v560_v40 = vrot.slane %v535_v6, %v559_v37  ;;  %v568_v41 = vrot.slane %v535_v6, %v567_v38 }
 0x12f   : > { %998 = vmatpush1.bf16.msra.mxu0 %v3381_v44  ;;  %1041 = vmatpush1.bf16.msra.mxu1 %v3383_v45 }
 0x130   : > { %999 = vmatprep.subr.bf16.mxu0 %v3390_v46  ;;  %1042 = vmatprep.subr.bf16.mxu1 %v3392_v47 }
 0x133   : > { %1000 = vmatpush1.bf16.msra.mxu0 %v3389_v52  ;;  %1043 = vmatpush1.bf16.msra.mxu1 %v3391_v53 }
 0x134   : > { %1001 = vmatprep.subr.bf16.mxu0 %v3398_v54  ;;  %1044 = vmatprep.subr.bf16.mxu1 %v3400_v55 }
 0x137   : > { %1002 = vmatpush1.bf16.msra.mxu0 %v3397_v60  ;;  %1045 = vmatpush1.bf16.msra.mxu1 %v3399_v61 }
 0x138   : > { %1003 = vmatprep.subr.bf16.mxu0 %v3406_v62  ;;  %1046 = vmatprep.subr.bf16.mxu1 %v3408_v63 }
 0x13b   : > { %1004 = vmatpush1.bf16.msra.mxu0 %v3405_v0  ;;  %1047 = vmatpush1.bf16.msra.mxu1 %v3407_v1 }
 0x13e   : > { %1022 = vmatmul.mubr.bf16.vlgmr.msra.gmra.mrb[4].mxu0 %v4790_v10  ;;  %1065 = vmatmul.mubr.bf16.vlgmr.msra.gmra.mrb[4].mxu1 %v4790_v10  ;;  %v551_v10 = vsub.s32 3, %v538_v4 }
 0x140   : > { %v552_v14 = vrot.slane %v535_v6, %v551_v10 }
 0x1f1   : > { %v937_v15 = vpop.f32.mrb[0].mxu0  ;;  %v980_v17 = vpop.f32.mrb[0].mxu1 }
 0x1f2   : > { %v938_v16 = vadd.f32 %v937_v15, %v540_v11  ;;  %v939_v18 = vpop.f32.mrb[1].mxu0  ;;  %v981_v19 = vadd.f32 %v980_v17, %v548_v12  ;;  %v982_v21 = vpop.f32.mrb[1].mxu1 }
 0x1f3   : > { %v940_v20 = vadd.f32 %v939_v18, %v544_v13  ;;  %v941_v22 = vpop.f32.mrb[2].mxu0  ;;  %v983_v23 = vadd.f32 %v982_v21, %v552_v14  ;;  %v984_v25 = vpop.f32.mrb[2].mxu1 }
 0x1f4   : > { %1075 = vst [vmem:[%s4785_s9] sm:$0xff] %v938_v16  ;;  %v942_v24 = vadd.f32 %v941_v22, %v540_v11  ;;  %v943_v26 = vpop.f32.mrb[3].mxu0  ;;  %1077 = vst [vmem:[%s4785_s9 + $0x10] sm:$0xff] %v981_v19  ;;  %v985_v27 = vadd.f32 %v984_v25, %v548_v12  ;;  %v986_v29 = vpop.f32.mrb[3].mxu1 }
 0x1f5   : > { %1076 = vst [vmem:[%s4785_s9 + $0x8] sm:$0xff] %v940_v20  ;;  %v944_v28 = vadd.f32 %v943_v26, %v544_v13  ;;  %1078 = vst [vmem:[%s4785_s9 + $0x18] sm:$0xff] %v983_v23  ;;  %v987_v31 = vadd.f32 %v986_v29, %v552_v14 }
 0x1f6   : > { %1083 = vst [vmem:[%s4785_s9 + $0x40] sm:$0xff] %v942_v24  ;;  %v1091_v30 = vpack.c.bf16 %v942_v24, %v938_v16  ;;  %1085 = vst [vmem:[%s4785_s9 + $0x50] sm:$0xff] %v985_v27  ;;  %v1093_v32 = vpack.c.bf16 %v985_v27, %v981_v19 }
 0x1f7   : > { %1084 = vst [vmem:[%s4785_s9 + $0x48] sm:$0xff] %v944_v28  ;;  %v1092_v33 = vpack.c.bf16 %v944_v28, %v940_v20  ;;  %1086 = vst [vmem:[%s4785_s9 + $0x58] sm:$0xff] %v987_v31  ;;  %v1094_v34 = vpack.c.bf16 %v987_v31, %v983_v23 }
 0x1f8   : > { %1099 = vst [vmem:[#allocation2] sm:$0xff] %v1091_v30  ;;  %1101 = vst [vmem:[#allocation2 + $0x10] sm:$0xff] %v1093_v32 }
 0x1f9   : > { %1100 = vst [vmem:[#allocation2 + $0x8] sm:$0xff] %v1092_v33  ;;  %1102 = vst [vmem:[#allocation2 + $0x18] sm:$0xff] %v1094_v34 }
 0x211   : > { %v1023_v42 = vpop.f32.mrb[4].mxu0  ;;  %v1066_v44 = vpop.f32.mrb[4].mxu1 }
 0x212   : > { %v1024_v43 = vadd.f32 %v1023_v42, %v556_v39  ;;  %v1025_v45 = vpop.f32.mrb[5].mxu0  ;;  %v1067_v46 = vadd.f32 %v1066_v44, %v564_v8  ;;  %v1068_v48 = vpop.f32.mrb[5].mxu1 }
 0x213   : > { %v1026_v47 = vadd.f32 %v1025_v45, %v560_v40  ;;  %v1027_v49 = vpop.f32.mrb[6].mxu0  ;;  %v1069_v50 = vadd.f32 %v1068_v48, %v568_v41  ;;  %v1070_v52 = vpop.f32.mrb[6].mxu1 }
 0x214   : > { %1079 = vst [vmem:[%s4785_s9 + $0x20] sm:$0xff] %v1024_v43  ;;  %v1028_v51 = vadd.f32 %v1027_v49, %v556_v39  ;;  %v1029_v53 = vpop.f32.mrb[7].mxu0  ;;  %1081 = vst [vmem:[%s4785_s9 + $0x30] sm:$0xff] %v1067_v46  ;;  %v1071_v54 = vadd.f32 %v1070_v52, %v564_v8  ;;  %v1072_v56 = vpop.f32.mrb[7].mxu1 }
 0x215   : > { %1080 = vst [vmem:[%s4785_s9 + $0x28] sm:$0xff] %v1026_v47  ;;  %v1030_v55 = vadd.f32 %v1029_v53, %v560_v40  ;;  %1082 = vst [vmem:[%s4785_s9 + $0x38] sm:$0xff] %v1069_v50  ;;  %v1073_v58 = vadd.f32 %v1072_v56, %v568_v41 }
 0x216   : > { %1087 = vst [vmem:[%s4785_s9 + $0x60] sm:$0xff] %v1028_v51  ;;  %v1095_v57 = vpack.c.bf16 %v1028_v51, %v1024_v43  ;;  %1089 = vst [vmem:[%s4785_s9 + $0x70] sm:$0xff] %v1071_v54  ;;  %v1097_v59 = vpack.c.bf16 %v1071_v54, %v1067_v46 }
 0x217   : > { %1088 = vst [vmem:[%s4785_s9 + $0x68] sm:$0xff] %v1030_v55  ;;  %v1096_v60 = vpack.c.bf16 %v1030_v55, %v1026_v47  ;;  %1090 = vst [vmem:[%s4785_s9 + $0x78] sm:$0xff] %v1073_v58  ;;  %v1098_v61 = vpack.c.bf16 %v1073_v58, %v1069_v50 }
 0x218   : > { %1103 = vst [vmem:[#allocation2 + $0x20] sm:$0xff] %v1095_v57  ;;  %1105 = vst [vmem:[#allocation2 + $0x30] sm:$0xff] %v1097_v59 }
 0x219   : > { %1104 = vst [vmem:[#allocation2 + $0x28] sm:$0xff] %v1096_v60  ;;  %1106 = vst [vmem:[#allocation2 + $0x38] sm:$0xff] %v1098_v61 }
 0x21a PF: > { %v3854_v62 = vld [vmem:[%s4765_s5 + $0x4] ss:$8 sps:$4 sm:$0xff]   ;;  %v3856_v63 = vld [vmem:[%s4765_s5] ss:$8 sps:$4 sm:$0xff]   ;;  %v3857_v0 = vld [vmem:[%s4765_s5 + $0x14] ss:$8 sps:$4 sm:$0xff]  }
 0x21b   : > { %1911 = vmatprep.subr.bf16.mxu0 %v3854_v62  ;;  %v3859_v1 = vld [vmem:[%s4765_s5 + $0x10] ss:$8 sps:$4 sm:$0xff]   ;;  %v3860_v2 = vld [vmem:[%s4765_s5 + $0x24] ss:$8 sps:$4 sm:$0xff]   ;;  %v3862_v3 = vld [vmem:[%s4765_s5 + $0x20] ss:$8 sps:$4 sm:$0xff]  }
 0x21c   : > { %1912 = vmatpush1.bf16.msra.mxu0 %v3856_v63  ;;  %v3863_v4 = vld [vmem:[%s4765_s5 + $0x34] ss:$8 sps:$4 sm:$0xff]   ;;  %v3865_v5 = vld [vmem:[%s4765_s5 + $0x30] ss:$8 sps:$4 sm:$0xff]   ;;  %v3866_v6 = vld [vmem:[%s4765_s5 + $0x44] ss:$8 sps:$4 sm:$0xff]  }
 0x21d   : > { %1913 = vmatprep.subr.bf16.mxu0 %v3857_v0  ;;  %v3868_v7 = vld [vmem:[%s4765_s5 + $0x40] ss:$8 sps:$4 sm:$0xff]   ;;  %v3869_v9 = vld [vmem:[%s4765_s5 + $0x54] ss:$8 sps:$4 sm:$0xff]   ;;  %v3871_v10 = vld [vmem:[%s4765_s5 + $0x50] ss:$8 sps:$4 sm:$0xff]  }
 0x21e   : > { %v3872_v11 = vld [vmem:[%s4765_s5 + $0x64] ss:$8 sps:$4 sm:$0xff]   ;;  %v1124_v12 = vld [vmem:[#allocation2 + $0x8] sm:$0xff]  ;;  %v3874_v13 = vld [vmem:[%s4765_s5 + $0x60] ss:$8 sps:$4 sm:$0xff]   ;;  %s5337_s21 = sld [smem:[#allocation27_spill]] }
 0x21f   : > { %1943 = vmatprep.mubr.bf16.mxu0 %v1124_v12  ;;  %v3875_v14 = vld [vmem:[%s4765_s5 + $0x74] ss:$8 sps:$4 sm:$0xff]   ;;  %v3877_v15 = vld [vmem:[%s4765_s5 + $0x70] ss:$8 sps:$4 sm:$0xff]   ;;  %v3878_v16 = vld [vmem:[%s4765_s5 + $0x84] ss:$8 sps:$4 sm:$0xff]  }
 0x220   : > { %1914 = vmatpush1.bf16.msra.mxu0 %v3859_v1  ;;  %v3880_v17 = vld [vmem:[%s4765_s5 + $0x80] ss:$8 sps:$4 sm:$0xff]   ;;  %v3881_v18 = vld [vmem:[%s4765_s5 + $0x94] ss:$8 sps:$4 sm:$0xff]   ;;  %v3883_v19 = vld [vmem:[%s4765_s5 + $0x90] ss:$8 sps:$4 sm:$0xff]  }
 0x221   : > { %1915 = vmatprep.subr.bf16.mxu0 %v3860_v2  ;;  %v3884_v20 = vld [vmem:[%s4765_s5 + $0xa4] ss:$8 sps:$4 sm:$0xff]   ;;  %v3886_v21 = vld [vmem:[%s4765_s5 + $0xa0] ss:$8 sps:$4 sm:$0xff]   ;;  %v3887_v22 = vld [vmem:[%s4765_s5 + $0xb4] ss:$8 sps:$4 sm:$0xff]  }
 0x222   : > { %v3889_v23 = vld [vmem:[%s4765_s5 + $0xb0] ss:$8 sps:$4 sm:$0xff]   ;;  %v3890_v24 = vld [vmem:[%s4765_s5 + $0xc4] ss:$8 sps:$4 sm:$0xff]   ;;  %v3892_v25 = vld [vmem:[%s4765_s5 + $0xc0] ss:$8 sps:$4 sm:$0xff]  }
 0x223   : > { %v3893_v26 = vld [vmem:[%s4765_s5 + $0xd4] ss:$8 sps:$4 sm:$0xff]   ;;  %v3895_v27 = vld [vmem:[%s4765_s5 + $0xd0] ss:$8 sps:$4 sm:$0xff]   ;;  %v3896_v28 = vld [vmem:[%s4765_s5 + $0xe4] ss:$8 sps:$4 sm:$0xff]  }
 0x224   : > { %1916 = vmatpush1.bf16.msra.mxu0 %v3862_v3  ;;  %v3898_v29 = vld [vmem:[%s4765_s5 + $0xe0] ss:$8 sps:$4 sm:$0xff]   ;;  %v3899_v30 = vld [vmem:[%s4765_s5 + $0xf4] ss:$8 sps:$4 sm:$0xff]   ;;  %v3901_v31 = vld [vmem:[%s4765_s5 + $0xf0] ss:$8 sps:$4 sm:$0xff]  }
 0x225   : > { %1917 = vmatprep.subr.bf16.mxu0 %v3863_v4  ;;  %v3904_v32 = vld [vmem:[%s4765_s5 + $0x104] ss:$8 sps:$4 sm:$0xff]   ;;  %v3902_v33 = vld [vmem:[%s4765_s5 + $0x100] ss:$8 sps:$4 sm:$0xff]   ;;  %v1123_v34 = vld [vmem:[#allocation2] sm:$0xff]  ;;  %s5338_s22 = sld [smem:[#allocation32_spill]] }
 0x226   : > { %v3907_v35 = vld [vmem:[%s4765_s5 + $0x114] ss:$8 sps:$4 sm:$0xff]   ;;  %v1126_v36 = vld [vmem:[#allocation2 + $0x18] sm:$0xff]  ;;  %v3905_v37 = vld [vmem:[%s4765_s5 + $0x110] ss:$8 sps:$4 sm:$0xff]   ;;  %s3677_s14 = sshll.u32 %s5337_s21, 11 }
 0x227   : > { %v3910_v38 = vld [vmem:[%s4765_s5 + $0x124] ss:$8 sps:$4 sm:$0xff]   ;;  %v3908_v39 = vld [vmem:[%s4765_s5 + $0x120] ss:$8 sps:$4 sm:$0xff]   ;;  %v3913_v8 = vld [vmem:[%s4765_s5 + $0x134] ss:$8 sps:$4 sm:$0xff]  }
 0x228   : > { %1918 = vmatpush1.bf16.msra.mxu0 %v3865_v5  ;;  %v3911_v40 = vld [vmem:[%s4765_s5 + $0x130] ss:$8 sps:$4 sm:$0xff]   ;;  %v3916_v41 = vld [vmem:[%s4765_s5 + $0x144] ss:$8 sps:$4 sm:$0xff]   ;;  %v3914_v42 = vld [vmem:[%s4765_s5 + $0x140] ss:$8 sps:$4 sm:$0xff]  }
 0x229   : > { %1919 = vmatprep.subr.bf16.mxu0 %v3866_v6  ;;  %v3919_v43 = vld [vmem:[%s4765_s5 + $0x154] ss:$8 sps:$4 sm:$0xff]   ;;  %v3917_v44 = vld [vmem:[%s4765_s5 + $0x150] ss:$8 sps:$4 sm:$0xff]   ;;  %v3922_v45 = vld [vmem:[%s4765_s5 + $0x164] ss:$8 sps:$4 sm:$0xff]  }
 0x22a   : > { %v3920_v46 = vld [vmem:[%s4765_s5 + $0x160] ss:$8 sps:$4 sm:$0xff]   ;;  %v3925_v47 = vld [vmem:[%s4765_s5 + $0x174] ss:$8 sps:$4 sm:$0xff]   ;;  %v3923_v48 = vld [vmem:[%s4765_s5 + $0x170] ss:$8 sps:$4 sm:$0xff]  }
 0x22b   : > { %v3928_v49 = vld [vmem:[%s4765_s5 + $0x184] ss:$8 sps:$4 sm:$0xff]   ;;  %v3926_v50 = vld [vmem:[%s4765_s5 + $0x180] ss:$8 sps:$4 sm:$0xff]   ;;  %v3931_v51 = vld [vmem:[%s4765_s5 + $0x194] ss:$8 sps:$4 sm:$0xff]  }
 0x22c   : > { %1920 = vmatpush1.bf16.msra.mxu0 %v3868_v7  ;;  %v3929_v52 = vld [vmem:[%s4765_s5 + $0x190] ss:$8 sps:$4 sm:$0xff]   ;;  %v3934_v53 = vld [vmem:[%s4765_s5 + $0x1a4] ss:$8 sps:$4 sm:$0xff]   ;;  %v3932_v54 = vld [vmem:[%s4765_s5 + $0x1a0] ss:$8 sps:$4 sm:$0xff]  }
 0x22d   : > { %1921 = vmatprep.subr.bf16.mxu0 %v3869_v9  ;;  %v3937_v55 = vld [vmem:[%s4765_s5 + $0x1b4] ss:$8 sps:$4 sm:$0xff]   ;;  %v3935_v56 = vld [vmem:[%s4765_s5 + $0x1b0] ss:$8 sps:$4 sm:$0xff]   ;;  %v3940_v57 = vld [vmem:[%s4765_s5 + $0x1c4] ss:$8 sps:$4 sm:$0xff]  }
 0x22e   : > { %v3938_v58 = vld [vmem:[%s4765_s5 + $0x1c0] ss:$8 sps:$4 sm:$0xff]   ;;  %v3943_v59 = vld [vmem:[%s4765_s5 + $0x1d4] ss:$8 sps:$4 sm:$0xff]   ;;  %v3941_v60 = vld [vmem:[%s4765_s5 + $0x1d0] ss:$8 sps:$4 sm:$0xff]  }
 0x22f   : > { %v3946_v61 = vld [vmem:[%s4765_s5 + $0x1e4] ss:$8 sps:$4 sm:$0xff]   ;;  %v3944_v62 = vld [vmem:[%s4765_s5 + $0x1e0] ss:$8 sps:$4 sm:$0xff]   ;;  %v3949_v63 = vld [vmem:[%s4765_s5 + $0x1f4] ss:$8 sps:$4 sm:$0xff]  }
 0x230   : > { %1922 = vmatpush1.bf16.msra.mxu0 %v3871_v10  ;;  %v3947_v0 = vld [vmem:[%s4765_s5 + $0x1f0] ss:$8 sps:$4 sm:$0xff]   ;;  %v3952_v1 = vld [vmem:[%s4765_s5 + $0x204] ss:$8 sps:$4 sm:$0xff]   ;;  %v3950_v2 = vld [vmem:[%s4765_s5 + $0x200] ss:$8 sps:$4 sm:$0xff]  }
 0x231   : > { %1923 = vmatprep.subr.bf16.mxu0 %v3872_v11  ;;  %v1125_v3 = vld [vmem:[#allocation2 + $0x10] sm:$0xff]  ;;  %v3955_v4 = vld [vmem:[%s4765_s5 + $0x214] ss:$8 sps:$4 sm:$0xff]   ;;  %v3953_v10 = vld [vmem:[%s4765_s5 + $0x210] ss:$8 sps:$4 sm:$0xff]   ;;  %s5339_s1 = sld [smem:[#allocation42_spill]] }
 0x232   : > { %v1128_v5 = vld [vmem:[#allocation2 + $0x28] sm:$0xff]  ;;  %v2105_v6 = vld [vmem:[%s4771_s10] sm:$0xff]  ;;  %s3112_s15 = sshll.u32 %s4785_s9, 4  ;;  %s3083_s28 = scalar_lea.sflag [#allocation16], %s4780_s7  ;;  %s5124_s15 = int_to_ptr.vmem [resolvable:$true] %s3112_s15 }
 0x233   : > { %v2109_v7 = vld [vmem:[%s4771_s10 + $0x20] sm:$0xff]  ;;  %s4220_s18 = scalar_lea.vmem %s5124_s15, 2048  ;;  %p5340_p12 = scmp.ne.s32.totalorder %s5338_s22, 0 }
 0x234   : > { %1924 = vmatpush1.bf16.msra.mxu0 %v3874_v13  ;;  %v2113_v9 = vld [vmem:[%s4771_s10 + $0x40] sm:$0xff]  ;;  %v3538_v11 = vcombine.high %v2105_v6, %v2109_v7  ;;  %v3537_v12 = vcombine.low %v2105_v6, %v2109_v7  ;;  %p4221_p6 = scmp.ne.s32.totalorder %s5124_s15, %s4220_s18  ;;  %s4402_s23 = smov [#allocation15]  }
 0x235   : > { %1925 = vmatprep.subr.bf16.mxu0 %v3875_v14  ;;  %v2117_v13 = vld [vmem:[%s4771_s10 + $0x60] sm:$0xff]  ;;  %s4224_s3 = sshll.u32 %s4402_s23, 4  ;;  %s4225_s3 = int_to_ptr.vmem [resolvable:$false] %s4224_s3 }
 0x236   : > { %v3958_v14 = vld [vmem:[%s4765_s5 + $0x224] ss:$8 sps:$4 sm:$0xff]   ;;  %2873 = vmatprep.subr.bf16.mxu1 %v3538_v11  ;;  %p4222_p9 = pnand %p4221_p6, %p5340_p12  ;;  %p4227_p11 = scmp.lt.s32.totalorder %s5124_s15, %s4225_s3 }
 0x237   : > { %2874 = vmatpush1.bf16.msra.mxu1 %v3537_v12  ;;  %v2197_v6 = vld [vmem:[%s4771_s10 + $0x2e0] sm:$0xff]  ;;  %s5121_s8 = scalar_lea.hbm %s5339_s1, %s3677_s14 }
 0x238   : > { %1926 = vmatpush1.bf16.msra.mxu0 %v3877_v15  ;;  %v3546_v15 = vcombine.high %v2113_v9, %v2117_v13  ;;  %v3988_v11 = vld [vmem:[%s4765_s5 + $0x2c4] ss:$8 sps:$4 sm:$0xff]   ;;  %p4223_p5 = pneg %p4222_p9 }
 0x239   : > { %1927 = vmatprep.subr.bf16.mxu0 %v3878_v16  ;;  %v2121_v16 = vld [vmem:[%s4771_s10 + $0x80] sm:$0xff] }
 0x23a   : > { %2875 = vmatprep.subr.bf16.mxu1 %v3546_v15  ;;  %v2201_v12 = vld [vmem:[%s4771_s10 + $0x300] sm:$0xff] }
 0x23b   : > { %v3986_v15 = vld [vmem:[%s4765_s5 + $0x2c0] ss:$8 sps:$4 sm:$0xff]  }
 0x23c   : > { %1928 = vmatpush1.bf16.msra.mxu0 %v3880_v17  ;;  %v2125_v17 = vld [vmem:[%s4771_s10 + $0xa0] sm:$0xff] }
 0x23d   : > { %1929 = vmatprep.subr.bf16.mxu0 %v3881_v18  ;;  %v3545_v18 = vcombine.low %v2113_v9, %v2117_v13  ;;  %v3983_v9 = vld [vmem:[%s4765_s5 + $0x2b0] ss:$8 sps:$4 sm:$0xff]   ;;  %v2205_v13 = vld [vmem:[%s4771_s10 + $0x320] sm:$0xff] }
 0x23f   : > { %2876 = vmatpush1.bf16.msra.mxu1 %v3545_v18  ;;  %v2209_v18 = vld [vmem:[%s4771_s10 + $0x340] sm:$0xff] }
 0x240   : > { %1930 = vmatpush1.bf16.msra.mxu0 %v3883_v19  ;;  %v3956_v19 = vld [vmem:[%s4765_s5 + $0x220] ss:$8 sps:$4 sm:$0xff]  }
 0x241   : > { %1931 = vmatprep.subr.bf16.mxu0 %v3884_v20  ;;  %v3554_v20 = vcombine.high %v2121_v16, %v2125_v17 }
 0x243   : > { %2877 = vmatprep.subr.bf16.mxu1 %v3554_v20  ;;  %v3633_v20 = vcombine.low %v2201_v12, %v2205_v13 }
 0x244   : > { %1932 = vmatpush1.bf16.msra.mxu0 %v3886_v21  ;;  %v3961_v21 = vld [vmem:[%s4765_s5 + $0x234] ss:$8 sps:$4 sm:$0xff]  }
 0x245   : > { %1933 = vmatprep.subr.bf16.mxu0 %v3887_v22  ;;  %v2129_v22 = vld [vmem:[%s4771_s10 + $0xc0] sm:$0xff] }
 0x248   : > { %1934 = vmatpush1.bf16.msra.mxu0 %v3889_v23  ;;  %v2133_v23 = vld [vmem:[%s4771_s10 + $0xe0] sm:$0xff] }
 0x249   : > { %1935 = vmatprep.subr.bf16.mxu0 %v3890_v24  ;;  %v3553_v24 = vcombine.low %v2121_v16, %v2125_v17  ;;  %v3634_v16 = vcombine.high %v2201_v12, %v2205_v13  ;;  %v3991_v17 = vld [vmem:[%s4765_s5 + $0x2d4] ss:$8 sps:$4 sm:$0xff]  }
 0x24b   : > { %2878 = vmatpush1.bf16.msra.mxu1 %v3553_v24 }
 0x24c   : > { %1936 = vmatpush1.bf16.msra.mxu0 %v3892_v25  ;;  %v3959_v25 = vld [vmem:[%s4765_s5 + $0x230] ss:$8 sps:$4 sm:$0xff]  }
 0x24d   : > { %1937 = vmatprep.subr.bf16.mxu0 %v3893_v26  ;;  %v3562_v26 = vcombine.high %v2129_v22, %v2133_v23 }
 0x24f   : > { %2879 = vmatprep.subr.bf16.mxu1 %v3562_v26  ;;  %v3997_v26 = vld [vmem:[%s4765_s5 + $0x2f4] ss:$8 sps:$4 sm:$0xff]  }
 0x250   : > { %1938 = vmatpush1.bf16.msra.mxu0 %v3895_v27  ;;  %v3964_v27 = vld [vmem:[%s4765_s5 + $0x244] ss:$8 sps:$4 sm:$0xff]  }
 0x251   : > { %1939 = vmatprep.subr.bf16.mxu0 %v3896_v28  ;;  %v2137_v28 = vld [vmem:[%s4771_s10 + $0x100] sm:$0xff] }
 0x254   : > { %1940 = vmatpush1.bf16.msra.mxu0 %v3898_v29  ;;  %v2141_v29 = vld [vmem:[%s4771_s10 + $0x120] sm:$0xff] }
 0x255   : > { %1941 = vmatprep.subr.bf16.mxu0 %v3899_v30  ;;  %v3561_v30 = vcombine.low %v2129_v22, %v2133_v23  ;;  %v3994_v23 = vld [vmem:[%s4765_s5 + $0x2e4] ss:$8 sps:$4 sm:$0xff]  }
 0x257   : > { %2880 = vmatpush1.bf16.msra.mxu1 %v3561_v30  ;;  %v1127_v30 = vld [vmem:[#allocation2 + $0x20] sm:$0xff] }
 0x258   : > { %1942 = vmatpush1.bf16.msra.mxu0 %v3901_v31  ;;  %v3962_v31 = vld [vmem:[%s4765_s5 + $0x240] ss:$8 sps:$4 sm:$0xff]  }
 0x259   : > { %1954 = vmatprep.subr.bf16.mxu0 %v3904_v32  ;;  %v3570_v32 = vcombine.high %v2137_v28, %v2141_v29 }
 0x25b   : > { %1944 = vmatmul.mubr.bf16.vlgmr.msra.gmra.mrb[0].mxu0 %v1123_v34  ;;  %v2145_v34 = vld [vmem:[%s4771_s10 + $0x140] sm:$0xff]  ;;  %2881 = vmatprep.subr.bf16.mxu1 %v3570_v32  ;;  %v1130_v32 = vld [vmem:[#allocation2 + $0x38] sm:$0xff] }
 0x25c   : > { %1955 = vmatpush1.bf16.msra.mxu0 %v3902_v33  ;;  %1986 = vmatprep.mubr.bf16.mxu0 %v1126_v36  ;;  %v3967_v33 = vld [vmem:[%s4765_s5 + $0x254] ss:$8 sps:$4 sm:$0xff]   ;;  %v3569_v36 = vcombine.low %v2137_v28, %v2141_v29  ;;  %v4000_v28 = vld [vmem:[%s4765_s5 + $0x304] ss:$8 sps:$4 sm:$0xff]   ;;  %v3998_v29 = vld [vmem:[%s4765_s5 + $0x300] ss:$8 sps:$4 sm:$0xff]  }
 0x25d   : > { %1956 = vmatprep.subr.bf16.mxu0 %v3907_v35  ;;  %v2149_v35 = vld [vmem:[%s4771_s10 + $0x160] sm:$0xff] }
 0x25e   : > { %2882 = vmatpush1.bf16.msra.mxu1 %v3569_v36  ;;  %v4009_v36 = vld [vmem:[%s4765_s5 + $0x334] ss:$8 sps:$4 sm:$0xff]  }
 0x260   : > { %1957 = vmatpush1.bf16.msra.mxu0 %v3905_v37  ;;  %v3965_v37 = vld [vmem:[%s4765_s5 + $0x250] ss:$8 sps:$4 sm:$0xff]  }
 0x261   : > { %1958 = vmatprep.subr.bf16.mxu0 %v3910_v38  ;;  %v3578_v38 = vcombine.high %v2145_v34, %v2149_v35 }
 0x263   : > { %2883 = vmatprep.subr.bf16.mxu1 %v3578_v38  ;;  %v4012_v38 = vld [vmem:[%s4765_s5 + $0x344] ss:$8 sps:$4 sm:$0xff]  }
 0x264   : > { %1959 = vmatpush1.bf16.msra.mxu0 %v3908_v39  ;;  %v3970_v39 = vld [vmem:[%s4765_s5 + $0x264] ss:$8 sps:$4 sm:$0xff]  }
 0x265   : > { %1960 = vmatprep.subr.bf16.mxu0 %v3913_v8  ;;  %v2153_v8 = vld [vmem:[%s4771_s10 + $0x180] sm:$0xff] }
 0x268   : > { %1961 = vmatpush1.bf16.msra.mxu0 %v3911_v40  ;;  %v2157_v40 = vld [vmem:[%s4771_s10 + $0x1a0] sm:$0xff] }
 0x269   : > { %1962 = vmatprep.subr.bf16.mxu0 %v3916_v41  ;;  %v3577_v41 = vcombine.low %v2145_v34, %v2149_v35  ;;  %v4006_v34 = vld [vmem:[%s4765_s5 + $0x324] ss:$8 sps:$4 sm:$0xff]   ;;  %v4004_v35 = vld [vmem:[%s4765_s5 + $0x320] ss:$8 sps:$4 sm:$0xff]  }
 0x26b   : > { %2884 = vmatpush1.bf16.msra.mxu1 %v3577_v41  ;;  %v4018_v41 = vld [vmem:[%s4765_s5 + $0x364] ss:$8 sps:$4 sm:$0xff]  }
 0x26c   : > { %1963 = vmatpush1.bf16.msra.mxu0 %v3914_v42  ;;  %v3968_v42 = vld [vmem:[%s4765_s5 + $0x260] ss:$8 sps:$4 sm:$0xff]  }
 0x26d   : > { %1964 = vmatprep.subr.bf16.mxu0 %v3919_v43  ;;  %v3586_v43 = vcombine.high %v2153_v8, %v2157_v40 }
 0x26f   : > { %2885 = vmatprep.subr.bf16.mxu1 %v3586_v43  ;;  %v4021_v43 = vld [vmem:[%s4765_s5 + $0x374] ss:$8 sps:$4 sm:$0xff]  }
 0x270   : > { %1965 = vmatpush1.bf16.msra.mxu0 %v3917_v44  ;;  %v3973_v44 = vld [vmem:[%s4765_s5 + $0x274] ss:$8 sps:$4 sm:$0xff]  }
 0x271   : > { %1966 = vmatprep.subr.bf16.mxu0 %v3922_v45  ;;  %v2161_v45 = vld [vmem:[%s4771_s10 + $0x1c0] sm:$0xff] }
 0x274   : > { %1967 = vmatpush1.bf16.msra.mxu0 %v3920_v46  ;;  %v2165_v46 = vld [vmem:[%s4771_s10 + $0x1e0] sm:$0xff] }
 0x275   : > { %1968 = vmatprep.subr.bf16.mxu0 %v3925_v47  ;;  %v3585_v47 = vcombine.low %v2153_v8, %v2157_v40  ;;  %v4015_v8 = vld [vmem:[%s4765_s5 + $0x354] ss:$8 sps:$4 sm:$0xff]   ;;  %v4013_v40 = vld [vmem:[%s4765_s5 + $0x350] ss:$8 sps:$4 sm:$0xff]  }
 0x277   : > { %2886 = vmatpush1.bf16.msra.mxu1 %v3585_v47  ;;  %v4027_v47 = vld [vmem:[%s4765_s5 + $0x394] ss:$8 sps:$4 sm:$0xff]  }
 0x278   : > { %1969 = vmatpush1.bf16.msra.mxu0 %v3923_v48  ;;  %v3971_v48 = vld [vmem:[%s4765_s5 + $0x270] ss:$8 sps:$4 sm:$0xff]  }
 0x279   : > { %1970 = vmatprep.subr.bf16.mxu0 %v3928_v49  ;;  %v3594_v49 = vcombine.high %v2161_v45, %v2165_v46 }
 0x27b   : > { %2887 = vmatprep.subr.bf16.mxu1 %v3594_v49  ;;  %v4030_v49 = vld [vmem:[%s4765_s5 + $0x3a4] ss:$8 sps:$4 sm:$0xff]  }
 0x27c   : > { %1971 = vmatpush1.bf16.msra.mxu0 %v3926_v50  ;;  %v3976_v50 = vld [vmem:[%s4765_s5 + $0x284] ss:$8 sps:$4 sm:$0xff]  }
 0x27d   : > { %1972 = vmatprep.subr.bf16.mxu0 %v3931_v51  ;;  %v2169_v51 = vld [vmem:[%s4771_s10 + $0x200] sm:$0xff] }
 0x280   : > { %1973 = vmatpush1.bf16.msra.mxu0 %v3929_v52  ;;  %v2173_v52 = vld [vmem:[%s4771_s10 + $0x220] sm:$0xff] }
 0x281   : > { %1974 = vmatprep.subr.bf16.mxu0 %v3934_v53  ;;  %v3593_v53 = vcombine.low %v2161_v45, %v2165_v46  ;;  %v4024_v45 = vld [vmem:[%s4765_s5 + $0x384] ss:$8 sps:$4 sm:$0xff]   ;;  %v4022_v46 = vld [vmem:[%s4765_s5 + $0x380] ss:$8 sps:$4 sm:$0xff]  }
 0x283   : > { %2888 = vmatpush1.bf16.msra.mxu1 %v3593_v53  ;;  %v4036_v53 = vld [vmem:[%s4765_s5 + $0x3c4] ss:$8 sps:$4 sm:$0xff]  }
 0x284   : > { %1975 = vmatpush1.bf16.msra.mxu0 %v3932_v54  ;;  %v3974_v54 = vld [vmem:[%s4765_s5 + $0x280] ss:$8 sps:$4 sm:$0xff]  }
 0x285   : > { %1976 = vmatprep.subr.bf16.mxu0 %v3937_v55  ;;  %v3602_v55 = vcombine.high %v2169_v51, %v2173_v52 }
 0x287   : > { %2889 = vmatprep.subr.bf16.mxu1 %v3602_v55  ;;  %v4039_v55 = vld [vmem:[%s4765_s5 + $0x3d4] ss:$8 sps:$4 sm:$0xff]  }
 0x288   : > { %1977 = vmatpush1.bf16.msra.mxu0 %v3935_v56  ;;  %v3979_v56 = vld [vmem:[%s4765_s5 + $0x294] ss:$8 sps:$4 sm:$0xff]  }
 0x289   : > { %1978 = vmatprep.subr.bf16.mxu0 %v3940_v57  ;;  %v2177_v57 = vld [vmem:[%s4771_s10 + $0x240] sm:$0xff] }
 0x28c   : > { %1979 = vmatpush1.bf16.msra.mxu0 %v3938_v58  ;;  %v2181_v58 = vld [vmem:[%s4771_s10 + $0x260] sm:$0xff] }
 0x28d   : > { %1980 = vmatprep.subr.bf16.mxu0 %v3943_v59  ;;  %v3601_v59 = vcombine.low %v2169_v51, %v2173_v52  ;;  %v4033_v51 = vld [vmem:[%s4765_s5 + $0x3b4] ss:$8 sps:$4 sm:$0xff]   ;;  %v4031_v52 = vld [vmem:[%s4765_s5 + $0x3b0] ss:$8 sps:$4 sm:$0xff]  }
 0x28f   : > { %2890 = vmatpush1.bf16.msra.mxu1 %v3601_v59  ;;  %v4045_v59 = vld [vmem:[%s4765_s5 + $0x3f4] ss:$8 sps:$4 sm:$0xff]  }
 0x290   : > { %1981 = vmatpush1.bf16.msra.mxu0 %v3941_v60  ;;  %v3977_v60 = vld [vmem:[%s4765_s5 + $0x290] ss:$8 sps:$4 sm:$0xff]  }
 0x291   : > { %1982 = vmatprep.subr.bf16.mxu0 %v3946_v61  ;;  %v3610_v61 = vcombine.high %v2177_v57, %v2181_v58 }
 0x293   : > { %2891 = vmatprep.subr.bf16.mxu1 %v3610_v61  ;;  %v1129_v61 = vld [vmem:[#allocation2 + $0x30] sm:$0xff] }
 0x294   : > { %1983 = vmatpush1.bf16.msra.mxu0 %v3944_v62  ;;  %v3982_v62 = vld [vmem:[%s4765_s5 + $0x2a4] ss:$8 sps:$4 sm:$0xff]  }
 0x295   : > { %1984 = vmatprep.subr.bf16.mxu0 %v3949_v63  ;;  %v2185_v63 = vld [vmem:[%s4771_s10 + $0x280] sm:$0xff] }
 0x298   : > { %1985 = vmatpush1.bf16.msra.mxu0 %v3947_v0  ;;  %v2189_v0 = vld [vmem:[%s4771_s10 + $0x2a0] sm:$0xff] }
 0x299   : > { %1997 = vmatprep.subr.bf16.mxu0 %v3952_v1  ;;  %v3609_v1 = vcombine.low %v2177_v57, %v2181_v58  ;;  %v3617_v7 = vcombine.low %v2185_v63, %v2189_v0  ;;  %v4042_v57 = vld [vmem:[%s4765_s5 + $0x3e4] ss:$8 sps:$4 sm:$0xff]   ;;  %v4040_v58 = vld [vmem:[%s4765_s5 + $0x3e0] ss:$8 sps:$4 sm:$0xff]  }
 0x29b   : > { %1987 = vmatmul.mubr.bf16.vlgmr.msra.gmra.mrb[0].mxu0 %v1125_v3  ;;  %v3618_v3 = vcombine.high %v2185_v63, %v2189_v0  ;;  %2892 = vmatpush1.bf16.msra.mxu1 %v3609_v1  ;;  %v2221_v63 = vld [vmem:[%s4771_s10 + $0x3a0] sm:$0xff] }
 0x29c   : > { %1998 = vmatpush1.bf16.msra.mxu0 %v3950_v2  ;;  %2029 = vmatprep.mubr.bf16.mxu0 %v1128_v5  ;;  %v3980_v2 = vld [vmem:[%s4765_s5 + $0x2a0] ss:$8 sps:$4 sm:$0xff]  }
 0x29d   : > { %1999 = vmatprep.subr.bf16.mxu0 %v3955_v4  ;;  %v3985_v4 = vld [vmem:[%s4765_s5 + $0x2b4] ss:$8 sps:$4 sm:$0xff]   ;;  %v2193_v5 = vld [vmem:[%s4771_s10 + $0x2c0] sm:$0xff]  ;;  %2893 = vmatprep.subr.bf16.mxu1 %v3618_v3 }
 0x29e   : > { %v2229_v3 = vld [vmem:[%s4771_s10 + $0x3e0] sm:$0xff] }
 0x29f   : > { %2894 = vmatpush1.bf16.msra.mxu1 %v3617_v7  ;;  %v2110_v7 = vld [vmem:[%s4771_s10 + $0x28] sm:$0xff] }
 0x2a0   : > { %2000 = vmatpush1.bf16.msra.mxu0 %v3953_v10  ;;  %v3626_v10 = vcombine.high %v2193_v5, %v2197_v6 }
 0x2a1   : > { %2001 = vmatprep.subr.bf16.mxu0 %v3958_v14  ;;  %v3625_v14 = vcombine.low %v2193_v5, %v2197_v6  ;;  %v2106_v6 = vld [vmem:[%s4771_s10 + $0x8] sm:$0xff] }
 0x2a2   : > { %2895 = vmatprep.subr.bf16.mxu1 %v3626_v10  ;;  %v3539_v10 = vcombine.low %v2106_v6, %v2110_v7 }
 0x2a3   : > { %2896 = vmatpush1.bf16.msra.mxu1 %v3625_v14  ;;  %v1259_v14 = vld [vmem:[%s4773_s25] sm:$0x3] }
 0x2a4   : > { %2002 = vmatpush1.bf16.msra.mxu0 %v3956_v19  ;;  %v2213_v19 = vld [vmem:[%s4771_s10 + $0x360] sm:$0xff]  ;;  %2897 = vmatprep.subr.bf16.mxu1 %v3634_v16 }
 0x2a5   : > { %2003 = vmatprep.subr.bf16.mxu0 %v3961_v21  ;;  %v3989_v21 = vld [vmem:[%s4765_s5 + $0x2d0] ss:$8 sps:$4 sm:$0xff]   ;;  %v3642_v22 = vcombine.high %v2209_v18, %v2213_v19  ;;  %v3641_v24 = vcombine.low %v2209_v18, %v2213_v19 }
 0x2a7   : > { %2898 = vmatpush1.bf16.msra.mxu1 %v3633_v20 }
 0x2a8   : > { %2004 = vmatpush1.bf16.msra.mxu0 %v3959_v25  ;;  %v3992_v25 = vld [vmem:[%s4765_s5 + $0x2e0] ss:$8 sps:$4 sm:$0xff]   ;;  %2899 = vmatprep.subr.bf16.mxu1 %v3642_v22 }
 0x2a9   : > { %2005 = vmatprep.subr.bf16.mxu0 %v3964_v27  ;;  %v3995_v27 = vld [vmem:[%s4765_s5 + $0x2f0] ss:$8 sps:$4 sm:$0xff]  }
 0x2ab   : > { %2900 = vmatpush1.bf16.msra.mxu1 %v3641_v24 }
 0x2ac   : > { %2006 = vmatpush1.bf16.msra.mxu0 %v3962_v31  ;;  %v4003_v31 = vld [vmem:[%s4765_s5 + $0x314] ss:$8 sps:$4 sm:$0xff]  }
 0x2ad   : > { %2007 = vmatprep.subr.bf16.mxu0 %v3967_v33  ;;  %v4001_v33 = vld [vmem:[%s4765_s5 + $0x310] ss:$8 sps:$4 sm:$0xff]  }
 0x2b0   : > { %2008 = vmatpush1.bf16.msra.mxu0 %v3965_v37  ;;  %v4007_v37 = vld [vmem:[%s4765_s5 + $0x330] ss:$8 sps:$4 sm:$0xff]  }
 0x2b1   : > { %2009 = vmatprep.subr.bf16.mxu0 %v3970_v39  ;;  %v4010_v39 = vld [vmem:[%s4765_s5 + $0x340] ss:$8 sps:$4 sm:$0xff]  }
 0x2b4   : > { %2010 = vmatpush1.bf16.msra.mxu0 %v3968_v42  ;;  %v4016_v42 = vld [vmem:[%s4765_s5 + $0x360] ss:$8 sps:$4 sm:$0xff]  }
 0x2b5   : > { %2011 = vmatprep.subr.bf16.mxu0 %v3973_v44  ;;  %v4019_v44 = vld [vmem:[%s4765_s5 + $0x370] ss:$8 sps:$4 sm:$0xff]  }
 0x2b8   : > { %2012 = vmatpush1.bf16.msra.mxu0 %v3971_v48  ;;  %v4025_v48 = vld [vmem:[%s4765_s5 + $0x390] ss:$8 sps:$4 sm:$0xff]  }
 0x2b9   : > { %2013 = vmatprep.subr.bf16.mxu0 %v3976_v50  ;;  %v4028_v50 = vld [vmem:[%s4765_s5 + $0x3a0] ss:$8 sps:$4 sm:$0xff]  }
 0x2bc   : > { %2014 = vmatpush1.bf16.msra.mxu0 %v3974_v54  ;;  %v4034_v54 = vld [vmem:[%s4765_s5 + $0x3c0] ss:$8 sps:$4 sm:$0xff]  }
 0x2bd   : > { %2015 = vmatprep.subr.bf16.mxu0 %v3979_v56  ;;  %v4037_v56 = vld [vmem:[%s4765_s5 + $0x3d0] ss:$8 sps:$4 sm:$0xff]  }
 0x2c0   : > { %2016 = vmatpush1.bf16.msra.mxu0 %v3977_v60  ;;  %v4043_v60 = vld [vmem:[%s4765_s5 + $0x3f0] ss:$8 sps:$4 sm:$0xff]   ;;  %s4226_s5 = scalar_lea.vmem %s4225_s3, 4096 }
 0x2c1   : > { %2017 = vmatprep.subr.bf16.mxu0 %v3982_v62  ;;  %v2217_v62 = vld [vmem:[%s4771_s10 + $0x380] sm:$0xff]  ;;  %p4228_p0 = scmp.lt.s32.totalorder %s4226_s5, %s4220_s18 }
 0x2c2   : > { %v3650_v0 = vcombine.high %v2217_v62, %v2221_v63  ;;  %v3649_v1 = vcombine.low %v2217_v62, %v2221_v63  ;;  %v2178_v62 = vld [vmem:[%s4771_s10 + $0x248] sm:$0xff] }
 0x2c3   : > { %v2182_v63 = vld [vmem:[%s4771_s10 + $0x268] sm:$0xff]  ;;  %p4229_p8 = por %p4228_p0, %p4227_p11 }
 0x2c4   : > { %2018 = vmatpush1.bf16.msra.mxu0 %v3980_v2  ;;  %2901 = vmatprep.subr.bf16.mxu1 %v3650_v0  ;;  %v2225_v2 = vld [vmem:[%s4771_s10 + $0x3c0] sm:$0xff] }
 0x2c5   : > { %2019 = vmatprep.subr.bf16.mxu0 %v3985_v4  ;;  %2902 = vmatpush1.bf16.msra.mxu1 %v3649_v1  ;;  %v3658_v4 = vcombine.high %v2225_v2, %v2229_v3  ;;  %v3657_v5 = vcombine.low %v2225_v2, %v2229_v3  ;;  %v3612_v1 = vcombine.high %v2178_v62, %v2182_v63  ;;  %v2186_v2 = vld [vmem:[%s4771_s10 + $0x288] sm:$0xff]  ;;  %p4230_p13 = pnand %p4229_p8, %p4223_p5 }
 0x2c6   : > { %v2190_v3 = vld [vmem:[%s4771_s10 + $0x2a8] sm:$0xff] }
 0x2c7   : > { %2903 = vmatprep.subr.bf16.mxu1 %v3658_v4  ;;  %v3611_v4 = vcombine.low %v2178_v62, %v2182_v63 }
 0x2c8   : > { %2020 = vmatpush1.bf16.msra.mxu0 %v3983_v9  ;;  %v3540_v9 = vcombine.high %v2106_v6, %v2110_v7  ;;  %v2194_v6 = vld [vmem:[%s4771_s10 + $0x2c8] sm:$0xff] }
 0x2c9   : > { %2021 = vmatprep.subr.bf16.mxu0 %v3988_v11  ;;  %2904 = vmatpush1.bf16.msra.mxu1 %v3657_v5  ;;  %v1261_v11 = vlaneseq  ;;  %v3620_v5 = vcombine.high %v2186_v2, %v2190_v3  ;;  %v2198_v7 = vld [vmem:[%s4771_s10 + $0x2e8] sm:$0xff] }
 0x2ca   : > { %2916 = vmatprep.subr.bf16.mxu1 %v3540_v9  ;;  %v3619_v9 = vcombine.low %v2186_v2, %v2190_v3 }
 0x2cb   : > { %v1262_v12 = vshrl.u32 %v1261_v11, 7  ;;  %v2202_v11 = vld [vmem:[%s4771_s10 + $0x308] sm:$0xff] }
 0x2cc   : > { %2022 = vmatpush1.bf16.msra.mxu0 %v3986_v15 }
 0x2cd   : > { %2023 = vmatprep.subr.bf16.mxu0 %v3991_v17  ;;  %v1263_v13 = vsub.s32 0, %v1262_v12  ;;  %v1267_v15 = vsub.s32 1, %v1262_v12  ;;  %v2206_v12 = vld [vmem:[%s4771_s10 + $0x328] sm:$0xff] }
 0x2cf   : > { %v1264_v16 = vrot.slane %v1259_v14, %v1263_v13  ;;  %v1268_v17 = vrot.slane %v1259_v14, %v1267_v15  ;;  %v3627_v13 = vcombine.low %v2194_v6, %v2198_v7  ;;  %v3636_v14 = vcombine.high %v2202_v11, %v2206_v12  ;;  %v2210_v15 = vld [vmem:[%s4771_s10 + $0x348] sm:$0xff] }
 0x2d0   : > { %2024 = vmatpush1.bf16.msra.mxu0 %v3989_v21 }
 0x2d1   : > { %2025 = vmatprep.subr.bf16.mxu0 %v3994_v23 }
 0x2d4   : > { %2026 = vmatpush1.bf16.msra.mxu0 %v3992_v25 }
 0x2d5   : > { %2027 = vmatprep.subr.bf16.mxu0 %v3997_v26 }
 0x2d8   : > { %2028 = vmatpush1.bf16.msra.mxu0 %v3995_v27 }
 0x2d9   : > { %2040 = vmatprep.subr.bf16.mxu0 %v4000_v28 }
 0x2db   : > { %2030 = vmatmul.mubr.bf16.vlgmr.msra.gmra.mrb[0].mxu0 %v1127_v30  ;;  %v2114_v30 = vld [vmem:[%s4771_s10 + $0x48] sm:$0xff] }
 0x2dc   : > { %2041 = vmatpush1.bf16.msra.mxu0 %v3998_v29  ;;  %2072 = vmatprep.mubr.bf16.mxu0 %v1130_v32 }
 0x2dd   : > { %2042 = vmatprep.subr.bf16.mxu0 %v4003_v31  ;;  %v2118_v31 = vld [vmem:[%s4771_s10 + $0x68] sm:$0xff] }
 0x2e0   : > { %2043 = vmatpush1.bf16.msra.mxu0 %v4001_v33 }
 0x2e1   : > { %2044 = vmatprep.subr.bf16.mxu0 %v4006_v34  ;;  %v3548_v34 = vcombine.high %v2114_v30, %v2118_v31 }
 0x2e4   : > { %2045 = vmatpush1.bf16.msra.mxu0 %v4004_v35  ;;  %v2122_v35 = vld [vmem:[%s4771_s10 + $0x88] sm:$0xff] }
 0x2e5   : > { %2046 = vmatprep.subr.bf16.mxu0 %v4009_v36  ;;  %v2126_v36 = vld [vmem:[%s4771_s10 + $0xa8] sm:$0xff] }
 0x2e8   : > { %2047 = vmatpush1.bf16.msra.mxu0 %v4007_v37  ;;  %v3547_v37 = vcombine.low %v2114_v30, %v2118_v31  ;;  %v2115_v31 = vld [vmem:[%s4771_s10 + $0x50] sm:$0xff] }
 0x2e9   : > { %2048 = vmatprep.subr.bf16.mxu0 %v4012_v38  ;;  %v3556_v38 = vcombine.high %v2122_v35, %v2126_v36 }
 0x2ec   : > { %2049 = vmatpush1.bf16.msra.mxu0 %v4010_v39  ;;  %v2130_v39 = vld [vmem:[%s4771_s10 + $0xc8] sm:$0xff] }
 0x2ed   : > { %2050 = vmatprep.subr.bf16.mxu0 %v4015_v8  ;;  %v2134_v8 = vld [vmem:[%s4771_s10 + $0xe8] sm:$0xff] }
 0x2f0   : > { %2051 = vmatpush1.bf16.msra.mxu0 %v4013_v40  ;;  %v3555_v40 = vcombine.low %v2122_v35, %v2126_v36 }
 0x2f1   : > { %2052 = vmatprep.subr.bf16.mxu0 %v4018_v41  ;;  %v3564_v41 = vcombine.high %v2130_v39, %v2134_v8 }
 0x2f4   : > { %2053 = vmatpush1.bf16.msra.mxu0 %v4016_v42  ;;  %v2138_v42 = vld [vmem:[%s4771_s10 + $0x108] sm:$0xff] }
 0x2f5   : > { %2054 = vmatprep.subr.bf16.mxu0 %v4021_v43  ;;  %v2142_v43 = vld [vmem:[%s4771_s10 + $0x128] sm:$0xff] }
 0x2f8   : > { %2055 = vmatpush1.bf16.msra.mxu0 %v4019_v44  ;;  %v3563_v44 = vcombine.low %v2130_v39, %v2134_v8 }
 0x2f9   : > { %2056 = vmatprep.subr.bf16.mxu0 %v4024_v45  ;;  %v3572_v45 = vcombine.high %v2138_v42, %v2142_v43 }
 0x2fc   : > { %2057 = vmatpush1.bf16.msra.mxu0 %v4022_v46  ;;  %v2146_v46 = vld [vmem:[%s4771_s10 + $0x148] sm:$0xff] }
 0x2fd   : > { %2058 = vmatprep.subr.bf16.mxu0 %v4027_v47  ;;  %v2150_v47 = vld [vmem:[%s4771_s10 + $0x168] sm:$0xff] }
 0x300   : > { %2059 = vmatpush1.bf16.msra.mxu0 %v4025_v48  ;;  %v3571_v48 = vcombine.low %v2138_v42, %v2142_v43 }
 0x301   : > { %2060 = vmatprep.subr.bf16.mxu0 %v4030_v49  ;;  %v3580_v49 = vcombine.high %v2146_v46, %v2150_v47 }
 0x304   : > { %2061 = vmatpush1.bf16.msra.mxu0 %v4028_v50  ;;  %v2154_v50 = vld [vmem:[%s4771_s10 + $0x188] sm:$0xff] }
 0x305   : > { %2062 = vmatprep.subr.bf16.mxu0 %v4033_v51  ;;  %v2158_v51 = vld [vmem:[%s4771_s10 + $0x1a8] sm:$0xff] }
 0x308   : > { %2063 = vmatpush1.bf16.msra.mxu0 %v4031_v52  ;;  %v3579_v52 = vcombine.low %v2146_v46, %v2150_v47 }
 0x309   : > { %2064 = vmatprep.subr.bf16.mxu0 %v4036_v53  ;;  %v3588_v53 = vcombine.high %v2154_v50, %v2158_v51 }
 0x30c   : > { %2065 = vmatpush1.bf16.msra.mxu0 %v4034_v54  ;;  %v2162_v54 = vld [vmem:[%s4771_s10 + $0x1c8] sm:$0xff] }
 0x30d   : > { %2066 = vmatprep.subr.bf16.mxu0 %v4039_v55  ;;  %v2166_v55 = vld [vmem:[%s4771_s10 + $0x1e8] sm:$0xff] }
 0x310   : > { %2067 = vmatpush1.bf16.msra.mxu0 %v4037_v56  ;;  %v3587_v56 = vcombine.low %v2154_v50, %v2158_v51 }
 0x311   : > { %2068 = vmatprep.subr.bf16.mxu0 %v4042_v57  ;;  %v3596_v57 = vcombine.high %v2162_v54, %v2166_v55 }
 0x314   : > { %2069 = vmatpush1.bf16.msra.mxu0 %v4040_v58  ;;  %v2170_v58 = vld [vmem:[%s4771_s10 + $0x208] sm:$0xff] }
 0x315   : > { %2070 = vmatprep.subr.bf16.mxu0 %v4045_v59  ;;  %v2174_v59 = vld [vmem:[%s4771_s10 + $0x228] sm:$0xff] }
 0x316   : > { %v3603_v0 = vcombine.low %v2170_v58, %v2174_v59 }
 0x318   : > { %2071 = vmatpush1.bf16.msra.mxu0 %v4043_v60  ;;  %v3595_v60 = vcombine.low %v2162_v54, %v2166_v55 }
 0x31b   : > { %2073 = vmatmul.mubr.bf16.vlgmr.msra.gmra.mrb[0].mxu0 %v1129_v61  ;;  %v3604_v61 = vcombine.high %v2170_v58, %v2174_v59 }
 0x3ee   : > { %v2074_v18 = vpop.f32.mrb[0].mxu0 }
 0x3ef   : > { %v3679_v19 = vadd.f32 %v2074_v18, %v1264_v16  ;;  %v2076_v20 = vpop.f32.mrb[1].mxu0 }
 0x3f0   : > { %v3680_v21 = vadd.f32 %v2076_v20, %v1268_v17  ;;  %v2078_v22 = vpop.f32.mrb[2].mxu0  ;;  %v2222_v20 = vld [vmem:[%s4771_s10 + $0x3a8] sm:$0xff] }
 0x3f1   : > { %v3681_v23 = vadd.f32 %v2078_v22, %v1264_v16  ;;  %v2080_v24 = vpop.f32.mrb[3].mxu0  ;;  %v2083_v26 = vmax.f32 %v3679_v19, 0.0  ;;  %v2214_v16 = vld [vmem:[%s4771_s10 + $0x368] sm:$0xff] }
 0x3f2   : > { %v3682_v25 = vadd.f32 %v2080_v24, %v1268_v17  ;;  %v2084_v28 = vmax.f32 %v3680_v21, 0.0  ;;  %v3635_v17 = vcombine.low %v2202_v11, %v2206_v12  ;;  %v3644_v18 = vcombine.high %v2210_v15, %v2214_v16  ;;  %v2218_v19 = vld [vmem:[%s4771_s10 + $0x388] sm:$0xff] }
 0x3f3   : > { %v2085_v27 = vmax.f32 %v3681_v23, 0.0  ;;  %v3643_v21 = vcombine.low %v2210_v15, %v2214_v16  ;;  %v3652_v22 = vcombine.high %v2218_v19, %v2222_v20  ;;  %v2226_v23 = vld [vmem:[%s4771_s10 + $0x3c8] sm:$0xff] }
 0x3f4   : > { %v2086_v29 = vmax.f32 %v3682_v25, 0.0  ;;  %v2230_v24 = vld [vmem:[%s4771_s10 + $0x3e8] sm:$0xff]  ;;  %v3651_v25 = vcombine.low %v2218_v19, %v2222_v20 }
 0x3f5   : > { %v4995_v32 = vpack.c.bf16 %v2085_v27, %v2083_v26  ;;  %v3660_v26 = vcombine.high %v2226_v23, %v2230_v24  ;;  %v2107_v27 = vld [vmem:[%s4771_s10 + $0x10] sm:$0xff] }
 0x3f6   : > { %v4997_v33 = vpack.c.bf16 %v2086_v29, %v2084_v28  ;;  %v2111_v28 = vld [vmem:[%s4771_s10 + $0x30] sm:$0xff]  ;;  %v3659_v29 = vcombine.low %v2226_v23, %v2230_v24 }
 0x3f7   : > { %v3542_v30 = vcombine.high %v2107_v27, %v2111_v28  ;;  %v3541_v35 = vcombine.low %v2107_v27, %v2111_v28 }
 0x3f8   : > { %2905 = vmatprep.mubr.bf16.mxu1 %v4997_v33 }
 0x3f9   : > { %2906 = vmatmul.mubr.bf16.vlgmr.msra.gmra.mrb[0].mxu1 %v4995_v32 }
 0x3fa   : > { %2917 = vmatpush1.bf16.msra.mxu1 %v3539_v10  ;;  %2948 = vmatprep.mubr.bf16.mxu1 %v4997_v33  ;;  %v3628_v10 = vcombine.high %v2194_v6, %v2198_v7 }
 0x3fb   : > { %2918 = vmatprep.subr.bf16.mxu1 %v3548_v34  ;;  %v2119_v34 = vld [vmem:[%s4771_s10 + $0x70] sm:$0xff] }
 0x3fc   : > { %v3550_v36 = vcombine.high %v2115_v31, %v2119_v34  ;;  %v3549_v39 = vcombine.low %v2115_v31, %v2119_v34 }
 0x3fe   : > { %2919 = vmatpush1.bf16.msra.mxu1 %v3547_v37  ;;  %v2123_v37 = vld [vmem:[%s4771_s10 + $0x90] sm:$0xff] }
 0x3ff   : > { %2920 = vmatprep.subr.bf16.mxu1 %v3556_v38  ;;  %v2127_v38 = vld [vmem:[%s4771_s10 + $0xb0] sm:$0xff] }
 0x400   : > { %v3558_v8 = vcombine.high %v2123_v37, %v2127_v38  ;;  %v3557_v42 = vcombine.low %v2123_v37, %v2127_v38 }
 0x402   : > { %2921 = vmatpush1.bf16.msra.mxu1 %v3555_v40  ;;  %v2131_v40 = vld [vmem:[%s4771_s10 + $0xd0] sm:$0xff] }
 0x403   : > { %2922 = vmatprep.subr.bf16.mxu1 %v3564_v41  ;;  %v2135_v41 = vld [vmem:[%s4771_s10 + $0xf0] sm:$0xff] }
 0x404   : > { %v3566_v43 = vcombine.high %v2131_v40, %v2135_v41  ;;  %v3565_v46 = vcombine.low %v2131_v40, %v2135_v41 }
 0x406   : > { %2923 = vmatpush1.bf16.msra.mxu1 %v3563_v44  ;;  %v2139_v44 = vld [vmem:[%s4771_s10 + $0x110] sm:$0xff] }
 0x407   : > { %2924 = vmatprep.subr.bf16.mxu1 %v3572_v45  ;;  %v2143_v45 = vld [vmem:[%s4771_s10 + $0x130] sm:$0xff] }
 0x408   : > { %v3574_v47 = vcombine.high %v2139_v44, %v2143_v45  ;;  %v3573_v50 = vcombine.low %v2139_v44, %v2143_v45 }
 0x40a   : > { %2925 = vmatpush1.bf16.msra.mxu1 %v3571_v48  ;;  %v2147_v48 = vld [vmem:[%s4771_s10 + $0x150] sm:$0xff] }
 0x40b   : > { %2926 = vmatprep.subr.bf16.mxu1 %v3580_v49  ;;  %v2151_v49 = vld [vmem:[%s4771_s10 + $0x170] sm:$0xff] }
 0x40c   : > { %v3582_v51 = vcombine.high %v2147_v48, %v2151_v49  ;;  %v3581_v54 = vcombine.low %v2147_v48, %v2151_v49  ;;  %v2148_v49 = vld [vmem:[%s4771_s10 + $0x158] sm:$0xff] }
 0x40e   : > { %2927 = vmatpush1.bf16.msra.mxu1 %v3579_v52  ;;  %v2155_v52 = vld [vmem:[%s4771_s10 + $0x190] sm:$0xff] }
 0x40f   : > { %2928 = vmatprep.subr.bf16.mxu1 %v3588_v53  ;;  %v2159_v53 = vld [vmem:[%s4771_s10 + $0x1b0] sm:$0xff] }
 0x410   : > { %v3590_v55 = vcombine.high %v2155_v52, %v2159_v53  ;;  %v3589_v58 = vcombine.low %v2155_v52, %v2159_v53  ;;  %v2156_v53 = vld [vmem:[%s4771_s10 + $0x198] sm:$0xff] }
 0x412   : > { %2929 = vmatpush1.bf16.msra.mxu1 %v3587_v56  ;;  %v2163_v56 = vld [vmem:[%s4771_s10 + $0x1d0] sm:$0xff] }
 0x413   : > { %2930 = vmatprep.subr.bf16.mxu1 %v3596_v57  ;;  %v2167_v57 = vld [vmem:[%s4771_s10 + $0x1f0] sm:$0xff] }
 0x414   : > { %v3598_v59 = vcombine.high %v2163_v56, %v2167_v57  ;;  %v3597_v62 = vcombine.low %v2163_v56, %v2167_v57  ;;  %v2164_v57 = vld [vmem:[%s4771_s10 + $0x1d8] sm:$0xff] }
 0x416   : > { %2931 = vmatpush1.bf16.msra.mxu1 %v3595_v60  ;;  %v2171_v60 = vld [vmem:[%s4771_s10 + $0x210] sm:$0xff] }
 0x417   : > { %2932 = vmatprep.subr.bf16.mxu1 %v3604_v61  ;;  %v2175_v61 = vld [vmem:[%s4771_s10 + $0x230] sm:$0xff] }
 0x418   : > { %v3606_v63 = vcombine.high %v2171_v60, %v2175_v61  ;;  %v3605_v2 = vcombine.low %v2171_v60, %v2175_v61  ;;  %v2172_v61 = vld [vmem:[%s4771_s10 + $0x218] sm:$0xff] }
 0x41a   : > { %2933 = vmatpush1.bf16.msra.mxu1 %v3603_v0  ;;  %v2179_v0 = vld [vmem:[%s4771_s10 + $0x250] sm:$0xff] }
 0x41b   : > { %2934 = vmatprep.subr.bf16.mxu1 %v3612_v1  ;;  %v2183_v1 = vld [vmem:[%s4771_s10 + $0x270] sm:$0xff] }
 0x41c   : > { %v3614_v3 = vcombine.high %v2179_v0, %v2183_v1  ;;  %v3613_v6 = vcombine.low %v2179_v0, %v2183_v1  ;;  %v2180_v1 = vld [vmem:[%s4771_s10 + $0x258] sm:$0xff] }
 0x41e   : > { %2935 = vmatpush1.bf16.msra.mxu1 %v3611_v4  ;;  %v2187_v4 = vld [vmem:[%s4771_s10 + $0x290] sm:$0xff] }
 0x41f   : > { %2936 = vmatprep.subr.bf16.mxu1 %v3620_v5  ;;  %v2191_v5 = vld [vmem:[%s4771_s10 + $0x2b0] sm:$0xff] }
 0x420   : > { %v3622_v7 = vcombine.high %v2187_v4, %v2191_v5  ;;  %v3621_v11 = vcombine.low %v2187_v4, %v2191_v5  ;;  %v2188_v5 = vld [vmem:[%s4771_s10 + $0x298] sm:$0xff] }
 0x422   : > { %2937 = vmatpush1.bf16.msra.mxu1 %v3619_v9  ;;  %v2195_v9 = vld [vmem:[%s4771_s10 + $0x2d0] sm:$0xff] }
 0x423   : > { %2938 = vmatprep.subr.bf16.mxu1 %v3628_v10  ;;  %v2199_v10 = vld [vmem:[%s4771_s10 + $0x2f0] sm:$0xff] }
 0x424   : > { %v3630_v12 = vcombine.high %v2195_v9, %v2199_v10  ;;  %v3629_v15 = vcombine.low %v2195_v9, %v2199_v10  ;;  %v2196_v10 = vld [vmem:[%s4771_s10 + $0x2d8] sm:$0xff] }
 0x426   : > { %2939 = vmatpush1.bf16.msra.mxu1 %v3627_v13  ;;  %v2203_v13 = vld [vmem:[%s4771_s10 + $0x310] sm:$0xff] }
 0x427   : > { %2940 = vmatprep.subr.bf16.mxu1 %v3636_v14  ;;  %v2207_v14 = vld [vmem:[%s4771_s10 + $0x330] sm:$0xff] }
 0x428   : > { %v3638_v16 = vcombine.high %v2203_v13, %v2207_v14  ;;  %v3637_v19 = vcombine.low %v2203_v13, %v2207_v14  ;;  %v2204_v14 = vld [vmem:[%s4771_s10 + $0x318] sm:$0xff] }
 0x42a   : > { %2941 = vmatpush1.bf16.msra.mxu1 %v3635_v17  ;;  %v2211_v17 = vld [vmem:[%s4771_s10 + $0x350] sm:$0xff] }
 0x42b   : > { %2942 = vmatprep.subr.bf16.mxu1 %v3644_v18  ;;  %v2215_v18 = vld [vmem:[%s4771_s10 + $0x370] sm:$0xff] }
 0x42c   : > { %v3646_v20 = vcombine.high %v2211_v17, %v2215_v18  ;;  %v3645_v23 = vcombine.low %v2211_v17, %v2215_v18  ;;  %v2212_v18 = vld [vmem:[%s4771_s10 + $0x358] sm:$0xff] }
 0x42e   : > { %2943 = vmatpush1.bf16.msra.mxu1 %v3643_v21  ;;  %v2219_v21 = vld [vmem:[%s4771_s10 + $0x390] sm:$0xff] }
 0x42f   : > { %2944 = vmatprep.subr.bf16.mxu1 %v3652_v22  ;;  %v2223_v22 = vld [vmem:[%s4771_s10 + $0x3b0] sm:$0xff] }
 0x430   : > { %v3654_v24 = vcombine.high %v2219_v21, %v2223_v22  ;;  %v3653_v27 = vcombine.low %v2219_v21, %v2223_v22  ;;  %v2220_v22 = vld [vmem:[%s4771_s10 + $0x398] sm:$0xff] }
 0x432   : > { %2945 = vmatpush1.bf16.msra.mxu1 %v3651_v25  ;;  %v2227_v25 = vld [vmem:[%s4771_s10 + $0x3d0] sm:$0xff] }
 0x433   : > { %2946 = vmatprep.subr.bf16.mxu1 %v3660_v26  ;;  %v2231_v26 = vld [vmem:[%s4771_s10 + $0x3f0] sm:$0xff] }
 0x434   : > { %v3662_v28 = vcombine.high %v2227_v25, %v2231_v26  ;;  %v3661_v31 = vcombine.low %v2227_v25, %v2231_v26  ;;  %v2228_v26 = vld [vmem:[%s4771_s10 + $0x3d8] sm:$0xff] }
 0x436   : > { %2947 = vmatpush1.bf16.msra.mxu1 %v3659_v29  ;;  %v2108_v29 = vld [vmem:[%s4771_s10 + $0x18] sm:$0xff] }
 0x437   : > { %2959 = vmatprep.subr.bf16.mxu1 %v3542_v30  ;;  %v2112_v30 = vld [vmem:[%s4771_s10 + $0x38] sm:$0xff] }
 0x438   : > { %v3544_v34 = vcombine.high %v2108_v29, %v2112_v30  ;;  %v3543_v37 = vcombine.low %v2108_v29, %v2112_v30 }
 0x439   : > { %2949 = vmatmul.mubr.bf16.vlgmr.msra.gmra.mrb[4].mxu1 %v4995_v32 }
 0x43a   : > { %2960 = vmatpush1.bf16.msra.mxu1 %v3541_v35  ;;  %2991 = vmatprep.mubr.bf16.mxu1 %v4997_v33  ;;  %v2116_v35 = vld [vmem:[%s4771_s10 + $0x58] sm:$0xff] }
 0x43b   : > { %2961 = vmatprep.subr.bf16.mxu1 %v3550_v36  ;;  %v2120_v36 = vld [vmem:[%s4771_s10 + $0x78] sm:$0xff] }
 0x43c   : > { %v3552_v38 = vcombine.high %v2116_v35, %v2120_v36  ;;  %v3551_v40 = vcombine.low %v2116_v35, %v2120_v36  ;;  %v2095_v36 = vld [vmem:[%s4783_s24 + $0x40] sm:$0xff] }
 0x43e   : > { %2962 = vmatpush1.bf16.msra.mxu1 %v3549_v39  ;;  %v2124_v39 = vld [vmem:[%s4771_s10 + $0x98] sm:$0xff] }
 0x43f   : > { %2963 = vmatprep.subr.bf16.mxu1 %v3558_v8  ;;  %v2128_v8 = vld [vmem:[%s4771_s10 + $0xb8] sm:$0xff] }
 0x440   : > { %v3560_v41 = vcombine.high %v2124_v39, %v2128_v8  ;;  %v3559_v44 = vcombine.low %v2124_v39, %v2128_v8  ;;  %v2096_v39 = vld [vmem:[%s4783_s24 + $0x48] sm:$0xff] }
 0x442   : > { %2964 = vmatpush1.bf16.msra.mxu1 %v3557_v42  ;;  %v2132_v42 = vld [vmem:[%s4771_s10 + $0xd8] sm:$0xff] }
 0x443   : > { %2965 = vmatprep.subr.bf16.mxu1 %v3566_v43  ;;  %v2136_v43 = vld [vmem:[%s4771_s10 + $0xf8] sm:$0xff] }
 0x444   : > { %v3568_v45 = vcombine.high %v2132_v42, %v2136_v43  ;;  %v3567_v48 = vcombine.low %v2132_v42, %v2136_v43  ;;  %v2089_v43 = vld [vmem:[%s4783_s24 + $0x10] sm:$0xff] }
 0x446   : > { %2966 = vmatpush1.bf16.msra.mxu1 %v3565_v46  ;;  %v2140_v46 = vld [vmem:[%s4771_s10 + $0x118] sm:$0xff] }
 0x447   : > { %2967 = vmatprep.subr.bf16.mxu1 %v3574_v47  ;;  %v2144_v47 = vld [vmem:[%s4771_s10 + $0x138] sm:$0xff] }
 0x44a   : > { %2968 = vmatpush1.bf16.msra.mxu1 %v3573_v50  ;;  %v2152_v50 = vld [vmem:[%s4771_s10 + $0x178] sm:$0xff] }
 0x44b   : > { %2969 = vmatprep.subr.bf16.mxu1 %v3582_v51  ;;  %v3575_v51 = vcombine.low %v2140_v46, %v2144_v47  ;;  %v3584_v52 = vcombine.high %v2148_v49, %v2152_v50 }
 0x44e   : > { %2970 = vmatpush1.bf16.msra.mxu1 %v3581_v54  ;;  %v2160_v54 = vld [vmem:[%s4771_s10 + $0x1b8] sm:$0xff] }
 0x44f   : > { %2971 = vmatprep.subr.bf16.mxu1 %v3590_v55  ;;  %v3583_v55 = vcombine.low %v2148_v49, %v2152_v50  ;;  %v3592_v56 = vcombine.high %v2156_v53, %v2160_v54 }
 0x452   : > { %2972 = vmatpush1.bf16.msra.mxu1 %v3589_v58  ;;  %v2168_v58 = vld [vmem:[%s4771_s10 + $0x1f8] sm:$0xff] }
 0x453   : > { %2973 = vmatprep.subr.bf16.mxu1 %v3598_v59  ;;  %v3591_v59 = vcombine.low %v2156_v53, %v2160_v54  ;;  %v3600_v60 = vcombine.high %v2164_v57, %v2168_v58 }
 0x456   : > { %2974 = vmatpush1.bf16.msra.mxu1 %v3597_v62  ;;  %v2176_v62 = vld [vmem:[%s4771_s10 + $0x238] sm:$0xff] }
 0x457   : > { %2975 = vmatprep.subr.bf16.mxu1 %v3606_v63  ;;  %v3599_v63 = vcombine.low %v2164_v57, %v2168_v58  ;;  %v3608_v0 = vcombine.high %v2172_v61, %v2176_v62 }
 0x45a   : > { %2976 = vmatpush1.bf16.msra.mxu1 %v3605_v2  ;;  %v2184_v2 = vld [vmem:[%s4771_s10 + $0x278] sm:$0xff] }
 0x45b   : > { %2977 = vmatprep.subr.bf16.mxu1 %v3614_v3  ;;  %v3607_v3 = vcombine.low %v2172_v61, %v2176_v62  ;;  %v3616_v4 = vcombine.high %v2180_v1, %v2184_v2 }
 0x45e   : > { %2978 = vmatpush1.bf16.msra.mxu1 %v3613_v6  ;;  %v2192_v6 = vld [vmem:[%s4771_s10 + $0x2b8] sm:$0xff] }
 0x45f   : > { %2979 = vmatprep.subr.bf16.mxu1 %v3622_v7  ;;  %v3615_v7 = vcombine.low %v2180_v1, %v2184_v2  ;;  %v3624_v9 = vcombine.high %v2188_v5, %v2192_v6 }
 0x462   : > { %2980 = vmatpush1.bf16.msra.mxu1 %v3621_v11  ;;  %v2200_v11 = vld [vmem:[%s4771_s10 + $0x2f8] sm:$0xff] }
 0x463   : > { %2981 = vmatprep.subr.bf16.mxu1 %v3630_v12  ;;  %v3623_v12 = vcombine.low %v2188_v5, %v2192_v6  ;;  %v3632_v13 = vcombine.high %v2196_v10, %v2200_v11 }
 0x466   : > { %2982 = vmatpush1.bf16.msra.mxu1 %v3629_v15  ;;  %v2208_v15 = vld [vmem:[%s4771_s10 + $0x338] sm:$0xff] }
 0x467   : > { %2983 = vmatprep.subr.bf16.mxu1 %v3638_v16  ;;  %v3631_v16 = vcombine.low %v2196_v10, %v2200_v11  ;;  %v3640_v17 = vcombine.high %v2204_v14, %v2208_v15 }
 0x46a   : > { %2984 = vmatpush1.bf16.msra.mxu1 %v3637_v19  ;;  %v2216_v19 = vld [vmem:[%s4771_s10 + $0x378] sm:$0xff] }
 0x46b   : > { %2985 = vmatprep.subr.bf16.mxu1 %v3646_v20  ;;  %v3639_v20 = vcombine.low %v2204_v14, %v2208_v15  ;;  %v3648_v21 = vcombine.high %v2212_v18, %v2216_v19 }
 0x46e   : > { %2986 = vmatpush1.bf16.msra.mxu1 %v3645_v23  ;;  %v2224_v23 = vld [vmem:[%s4771_s10 + $0x3b8] sm:$0xff] }
 0x46f   : > { %2987 = vmatprep.subr.bf16.mxu1 %v3654_v24  ;;  %v3647_v24 = vcombine.low %v2212_v18, %v2216_v19  ;;  %v3656_v25 = vcombine.high %v2220_v22, %v2224_v23 }
 0x472   : > { %2988 = vmatpush1.bf16.msra.mxu1 %v3653_v27  ;;  %v2232_v27 = vld [vmem:[%s4771_s10 + $0x3f8] sm:$0xff] }
 0x473   : > { %2989 = vmatprep.subr.bf16.mxu1 %v3662_v28  ;;  %v3655_v28 = vcombine.low %v2220_v22, %v2224_v23  ;;  %v3664_v29 = vcombine.high %v2228_v26, %v2232_v27  ;;  %v3663_v30 = vcombine.low %v2228_v26, %v2232_v27 }
 0x476   : > { %2990 = vmatpush1.bf16.msra.mxu1 %v3661_v31  ;;  %v2087_v31 = vld [vmem:[%s4783_s24] sm:$0xff] }
 0x477   : > { %3002 = vmatprep.subr.bf16.mxu1 %v3544_v34  ;;  %v2088_v34 = vld [vmem:[%s4783_s24 + $0x8] sm:$0xff] }
 0x479   : > { %2992 = vmatmul.mubr.bf16.vlgmr.msra.gmra.mrb[8].mxu1 %v4995_v32 }
 0x47a   : > { %3003 = vmatpush1.bf16.msra.mxu1 %v3543_v37  ;;  %3034 = vmatprep.mubr.bf16.mxu1 %v4997_v33  ;;  %v3576_v33 = vcombine.high %v2140_v46, %v2144_v47  ;;  %v2097_v46 = vld [vmem:[%s4783_s24 + $0x50] sm:$0xff] }
 0x47b   : > { %3004 = vmatprep.subr.bf16.mxu1 %v3552_v38 }
 0x47e   : > { %3005 = vmatpush1.bf16.msra.mxu1 %v3551_v40 }
 0x47f   : > { %3006 = vmatprep.subr.bf16.mxu1 %v3560_v41 }
 0x482   : > { %3007 = vmatpush1.bf16.msra.mxu1 %v3559_v44  ;;  %v2090_v44 = vld [vmem:[%s4783_s24 + $0x18] sm:$0xff] }
 0x483   : > { %3008 = vmatprep.subr.bf16.mxu1 %v3568_v45 }
 0x486   : > { %3009 = vmatpush1.bf16.msra.mxu1 %v3567_v48 }
 0x487   : > { %3010 = vmatprep.subr.bf16.mxu1 %v3576_v33  ;;  %v2098_v33 = vld [vmem:[%s4783_s24 + $0x58] sm:$0xff] }
 0x48a   : > { %3011 = vmatpush1.bf16.msra.mxu1 %v3575_v51 }
 0x48b   : > { %3012 = vmatprep.subr.bf16.mxu1 %v3584_v52 }
 0x48e   : > { %3013 = vmatpush1.bf16.msra.mxu1 %v3583_v55 }
 0x48f   : > { %3014 = vmatprep.subr.bf16.mxu1 %v3592_v56 }
 0x492   : > { %3015 = vmatpush1.bf16.msra.mxu1 %v3591_v59 }
 0x493   : > { %3016 = vmatprep.subr.bf16.mxu1 %v3600_v60 }
 0x496   : > { %3017 = vmatpush1.bf16.msra.mxu1 %v3599_v63 }
 0x497   : > { %3018 = vmatprep.subr.bf16.mxu1 %v3608_v0 }
 0x49a   : > { %3019 = vmatpush1.bf16.msra.mxu1 %v3607_v3 }
 0x49b   : > { %3020 = vmatprep.subr.bf16.mxu1 %v3616_v4 }
 0x49e   : > { %3021 = vmatpush1.bf16.msra.mxu1 %v3615_v7 }
 0x49f   : > { %3022 = vmatprep.subr.bf16.mxu1 %v3624_v9 }
 0x4a2   : > { %3023 = vmatpush1.bf16.msra.mxu1 %v3623_v12 }
 0x4a3   : > { %3024 = vmatprep.subr.bf16.mxu1 %v3632_v13 }
 0x4a6   : > { %3025 = vmatpush1.bf16.msra.mxu1 %v3631_v16 }
 0x4a7   : > { %3026 = vmatprep.subr.bf16.mxu1 %v3640_v17 }
 0x4aa   : > { %3027 = vmatpush1.bf16.msra.mxu1 %v3639_v20 }
 0x4ab   : > { %3028 = vmatprep.subr.bf16.mxu1 %v3648_v21 }
 0x4ae   : > { %3029 = vmatpush1.bf16.msra.mxu1 %v3647_v24 }
 0x4af   : > { %3030 = vmatprep.subr.bf16.mxu1 %v3656_v25 }
 0x4b2   : > { %3031 = vmatpush1.bf16.msra.mxu1 %v3655_v28 }
 0x4b3   : > { %3032 = vmatprep.subr.bf16.mxu1 %v3664_v29 }
 0x4b6   : > { %3033 = vmatpush1.bf16.msra.mxu1 %v3663_v30 }
 0x4b9   : > { %3035 = vmatmul.mubr.bf16.vlgmr.msra.gmra.mrb[12].mxu1 %v4995_v32 }
 0x4cc   : > { %v2907_v35 = vpop.f32.mrb[0].mxu1 }
 0x4cd   : > { %v3045_v37 = vadd.f32 %v2907_v35, %v2087_v31  ;;  %v2909_v38 = vpop.f32.mrb[1].mxu1 }
 0x4ce   : > { %v3046_v8 = vadd.f32 %v2909_v38, %v2088_v34  ;;  %v2911_v40 = vpop.f32.mrb[2].mxu1 }
 0x4cf   : > { %3061 = vst [vmem:[%s4783_s24] sm:$0xff] %v3045_v37  ;;  %v3053_v41 = vadd.f32 %v2911_v40, %v2095_v36  ;;  %v2913_v42 = vpop.f32.mrb[3].mxu1 }
 0x4d0   : > { %3062 = vst [vmem:[%s4783_s24 + $0x8] sm:$0xff] %v3046_v8  ;;  %v3054_v32 = vadd.f32 %v2913_v42, %v2096_v39 }
 0x4d1   : > { %3069 = vst [vmem:[%s4783_s24 + $0x40] sm:$0xff] %v3053_v41 }
 0x4d2   : > { %3070 = vst [vmem:[%s4783_s24 + $0x48] sm:$0xff] %v3054_v32 }
 0x50c   : > { %v2950_v45 = vpop.f32.mrb[4].mxu1 }
 0x50d   : > { %v3047_v47 = vadd.f32 %v2950_v45, %v2089_v43  ;;  %v2952_v48 = vpop.f32.mrb[5].mxu1 }
 0x50e   : > { %v3048_v49 = vadd.f32 %v2952_v48, %v2090_v44  ;;  %v2954_v50 = vpop.f32.mrb[6].mxu1 }
 0x50f   : > { %3063 = vst [vmem:[%s4783_s24 + $0x10] sm:$0xff] %v3047_v47  ;;  %v3055_v51 = vadd.f32 %v2954_v50, %v2097_v46  ;;  %v2956_v52 = vpop.f32.mrb[7].mxu1 }
 0x510   : > { %3064 = vst [vmem:[%s4783_s24 + $0x18] sm:$0xff] %v3048_v49  ;;  %v3056_v53 = vadd.f32 %v2956_v52, %v2098_v33 }
 0x511   : > { %3071 = vst [vmem:[%s4783_s24 + $0x50] sm:$0xff] %v3055_v51 }
 0x512   : > { %3072 = vst [vmem:[%s4783_s24 + $0x58] sm:$0xff] %v3056_v53 }
 0x513   : > { %4233 = shalt.err (!%p4230_p13)
}
 0x514   : > { %s4234_s27 = scalar_lea.hbm %s5121_s8, 2048  ;;  %s4238_s25 = scalar_lea.hbm %s5339_s1, 4096 }
 0x515   : > { %p4235_p2 = scmp.ne.s32.totalorder %s5121_s8, %s4234_s27  ;;  %p4239_p1 = scmp.lt.u32.totalorder %s5121_s8, %s5339_s1 }
 0x516   : > { %p4240_p4 = scmp.lt.u32.totalorder %s4238_s25, %s4234_s27  ;;  %p4242_p6 = scmp.lt.u32.totalorder %s4234_s27, %s5121_s8 }
 0x517   : > { %p4236_p7 = pnand %p4235_p2, %p5340_p12 }
 0x518   : > { %p4241_p3 = por %p4240_p4, %p4239_p1 }
 0x519   : > { %p4237_p10 = pneg %p4236_p7 }
 0x51a   : > { %p4243_p9 = por %p4242_p6, %p4241_p3 }
 0x51c   : > { %p4244_p5 = pnand %p4243_p9, %p4237_p10 }
 0x51e   : > { %4247 = shalt.err (!%p4244_p5)
}
 0x51f   : > { %s4403_s9 = smov 1024   ;;  %s4404_s16 = smov 64   ;;  %v2091_v54 = vld [vmem:[%s4783_s24 + $0x20] sm:$0xff]  ;;  %v2092_v55 = vld [vmem:[%s4783_s24 + $0x28] sm:$0xff]  ;;  %v2093_v2 = vld [vmem:[%s4783_s24 + $0x30] sm:$0xff] }
 0x520   : > { %3714 = dma.vmem_to_hbm [thread:$0]  (%p5340_p12), %s5124_s15, 2048, %s5121_s8, %s3083_s28, %s4403_s9, %s4403_s9, %s4404_s16  }
 0x521   : > { %v2099_v57 = vld [vmem:[%s4783_s24 + $0x60] sm:$0xff]  ;;  %v2100_v60 = vld [vmem:[%s4783_s24 + $0x68] sm:$0xff]  ;;  %v2094_v3 = vld [vmem:[%s4783_s24 + $0x38] sm:$0xff]  ;;  %s3096_s6 = sshll.u32 %s4783_s24, 4  ;;  %s5341_s15 = sld [smem:[#allocation41_spill]]  ;;  %s5175_s6 = int_to_ptr.vmem [resolvable:$true] %s3096_s6 }
 0x522   : > { %v2101_v5 = vld [vmem:[%s4783_s24 + $0x70] sm:$0xff]  ;;  %v2102_v9 = vld [vmem:[%s4783_s24 + $0x78] sm:$0xff]  ;;  %s3078_s18 = scalar_lea.sflag [#allocation5], %s4780_s7  ;;  %s4248_s23 = scalar_lea.vmem %s5175_s6, 2048 }
 0x523   : > { %p4249_p11 = scmp.ne.s32.totalorder %s5175_s6, %s4248_s23  ;;  %s4405_s3 = smov [#allocation14]  }
 0x524   : > { %s4252_s21 = sshll.u32 %s4405_s3, 4  ;;  %s4253_s21 = int_to_ptr.vmem [resolvable:$false] %s4252_s21 }
 0x525   : > { %p4250_p0 = pnand %p4249_p11, %p5340_p12  ;;  %s4254_s5 = scalar_lea.vmem %s4253_s21, 4096 }
 0x526   : > { %p4255_p13 = scmp.lt.s32.totalorder %s5175_s6, %s4253_s21  ;;  %p4256_p2 = scmp.lt.s32.totalorder %s4254_s5, %s4248_s23 }
 0x527   : > { %s5173_s28 = scalar_lea.hbm %s5341_s15, %s3677_s14  ;;  %p4251_p8 = pneg %p4250_p0 }
 0x528   : > { %p4257_p7 = por %p4256_p2, %p4255_p13 }
 0x52a   : > { %p4258_p10 = pnand %p4257_p7, %p4251_p8 }
 0x54c   : > { %v2993_v56 = vpop.f32.mrb[8].mxu1 }
 0x54d   : > { %v3049_v58 = vadd.f32 %v2993_v56, %v2091_v54  ;;  %v2995_v59 = vpop.f32.mrb[9].mxu1 }
 0x54e   : > { %v3050_v61 = vadd.f32 %v2995_v59, %v2092_v55  ;;  %v2997_v62 = vpop.f32.mrb[10].mxu1 }
 0x54f   : > { %3065 = vst [vmem:[%s4783_s24 + $0x20] sm:$0xff] %v3049_v58  ;;  %v3057_v63 = vadd.f32 %v2997_v62, %v2099_v57  ;;  %v2999_v0 = vpop.f32.mrb[11].mxu1 }
 0x550   : > { %3066 = vst [vmem:[%s4783_s24 + $0x28] sm:$0xff] %v3050_v61  ;;  %v3058_v1 = vadd.f32 %v2999_v0, %v2100_v60 }
 0x551   : > { %3073 = vst [vmem:[%s4783_s24 + $0x60] sm:$0xff] %v3057_v63 }
 0x552   : > { %3074 = vst [vmem:[%s4783_s24 + $0x68] sm:$0xff] %v3058_v1 }
 0x58c   : > { %v3036_v4 = vpop.f32.mrb[12].mxu1 }
 0x58d   : > { %v3051_v6 = vadd.f32 %v3036_v4, %v2093_v2  ;;  %v3038_v7 = vpop.f32.mrb[13].mxu1 }
 0x58e   : > { %v3052_v10 = vadd.f32 %v3038_v7, %v2094_v3  ;;  %v3040_v11 = vpop.f32.mrb[14].mxu1 }
 0x58f   : > { %3067 = vst [vmem:[%s4783_s24 + $0x30] sm:$0xff] %v3051_v6  ;;  %v3059_v12 = vadd.f32 %v3040_v11, %v2101_v5  ;;  %v3042_v13 = vpop.f32.mrb[15].mxu1 }
 0x590   : > { %3068 = vst [vmem:[%s4783_s24 + $0x38] sm:$0xff] %v3052_v10  ;;  %v3060_v14 = vadd.f32 %v3042_v13, %v2102_v9 }
 0x591   : > { %3075 = vst [vmem:[%s4783_s24 + $0x70] sm:$0xff] %v3059_v12 }
 0x592   : > { %3076 = vst [vmem:[%s4783_s24 + $0x78] sm:$0xff] %v3060_v14 }
 0x593   : > { %4261 = shalt.err (!%p4258_p10)
}
 0x594   : > { %s4262_s24 = scalar_lea.hbm %s5173_s28, 2048  ;;  %s4266_s10 = scalar_lea.hbm %s5341_s15, 4096 }
 0x595   : > { %p4263_p1 = scmp.ne.s32.totalorder %s5173_s28, %s4262_s24  ;;  %p4267_p6 = scmp.lt.u32.totalorder %s5173_s28, %s5341_s15 }
 0x596   : > { %p4268_p9 = scmp.lt.u32.totalorder %s4266_s10, %s4262_s24  ;;  %p4270_p11 = scmp.lt.u32.totalorder %s4262_s24, %s5173_s28 }
 0x597   : > { %p4264_p4 = pnand %p4263_p1, %p5340_p12 }
 0x598   : > { %p4269_p5 = por %p4268_p9, %p4267_p6 }
 0x599   : > { %p4265_p3 = pneg %p4264_p4 }
 0x59a   : > { %p4271_p0 = por %p4270_p11, %p4269_p5 }
 0x59c   : > { %p4272_p8 = pnand %p4271_p0, %p4265_p3 }
 0x59e   : > { %4275 = shalt.err (!%p4272_p8)
}
 0x59f   : > { %3713 = dma.vmem_to_hbm [thread:$0]  (%p5340_p12), %s5175_s6, 2048, %s5173_s28, %s3078_s18, %s4403_s9, %s4403_s9, %s4404_s16  }
 0x5a0 PF: > { %s5342_s17 = sld [smem:[#allocation23_spill]]  ;;  %s5343_s30 = sld [smem:[#allocation33_spill]] }
 0x5a1   : > { %p3751_p13 = scmp.ge.s32.totalorder %s4386_s11, 2 }
 0x5a6   : > { %s3127_s12 = sand.u32 1, %s5342_s17   ;;  %p5344_p2 = scmp.ne.s32.totalorder %s5343_s30, 0 }
 0x5a7   : > { %s3128_s8 = scalar_lea.sflag [#allocation5], %s3127_s12 }
 0x5a8   : > { %p3738_p7 = pnand %p3751_p13, %p5344_p2 }
 0x5aa   : > { %4337 = dma.done.wait (!%p3738_p7), %s3128_s8, 2048  }
 0x5ab   : > { %4339 = vsyncadd (!%p3738_p7), %s3128_s8, 4294965248  ;;  %s3137_s22 = scalar_lea.sflag [#allocation16], %s3127_s12 }
 0x5ac   : > { %4341 = dma.done.wait (!%p3738_p7), %s3137_s22, 2048  }
 0x5ad   : > { %4343 = vsyncadd (!%p3738_p7), %s3137_s22, 4294965248  ;;  %s32_s11 = sadd.s32 1, %s4386_s11   ;;  %s5345_s24 = sld [smem:[#allocation24_spill]] }
 0x5ae   : > { %p29_p10 = scmp.ge.s32.totalorder %s32_s11, 6   ;;  %s5346_s27 = sld [smem:[#allocation25_spill]] }
 0x5af   : > { %s5347_s7 = sld [smem:[#allocation37_spill]]  ;;  %s5348_s30 = sld [smem:[#allocation28_spill]] }
 0x5b0   : > { %s5349_s8 = sld [smem:[#allocation29_spill]]  ;;  %s5350_s9 = sld [smem:[#allocation35_spill]] }
 0x5b1   : > { %s5351_s10 = sld [smem:[#allocation36_spill]]  ;;  %s5352_s25 = smov %s4354_s26 }
 0x5b2   : > { %s5353_s26 = smov %s4609_s19  ;;  %s5354_s28 = smov %s4366_s29 }
 0x5b3   :  { %31 = sbr.rel (!%p29_p10) target bundleno = 21 (0x15), region = 147 }
 0x5b5   : > { %s5355_s29 = smov %s5347_s7 }
 0x5ba   :  { %3142 = vsyncpa [#allocation4], 1 }
 0x5bb   :  { %3144 = vsyncpa [#allocation4 + $0x1], 1 }
 0x5bc   :  { %3145 = vsyncpa [#allocation7], 1 }
 0x5bd   :  { %3146 = vsyncpa [#allocation10], 1 }
 0x5be   :  { %3148 = vsyncpa [#allocation10 + $0x1], 1 }
 0x5bf   :  { %3149 = vsyncpa [#allocation13], 1 }
 0x5c0   :  { %3151 = vsyncpa [#allocation13 + $0x1], 1 }
 0x5c1   :  { %3152 = vsyncpa [#allocation5], 1 }
 0x5c2   :  { %3154 = vsyncpa [#allocation5 + $0x1], 1 }
 0x5c3   :  { %3155 = vsyncpa [#allocation16], 1 }
 0x5c4   :  { %3157 = vsyncpa [#allocation16 + $0x1], 1 }

</bundles_post_ra>
